<compile_context>
chip_gen: v7x
topology: tpu7x:2x2x1
jax: 0.10.0
libtpu: 0.0.40
codegen_flags: <defaults>
</compile_context>

<pallas_src>
import functools
import math

import jax
import jax.numpy as jnp
from jax.experimental import pallas as pl
from jax.experimental.pallas import tpu as pltpu


def _conv3x3_fold(x, w, b, *, H, W, C):
    """3x3 SAME conv as a single MXU matmul.

    x: (H, W, C) bf16 input.
    w: (3C, 3C) bf16.  Rows = (kw, Cin) im2col contraction; columns = the three kh output
       slabs (kh-major, Cout-minor).
    b: (1, C) f32 bias.
    Returns (H, W, C) f32 (bias added, no activation).
    """
    # dx in {-1, 0, +1}: zero-column pad + static slices, built entirely in bf16.
    zcol = jnp.zeros((H, 1, C), jnp.bfloat16)
    xw = jnp.concatenate([zcol, x, zcol], axis=1)                       # (H, W+2, C)
    xcat = jnp.concatenate([xw[:, 0:W], x, xw[:, 2:W + 2]], axis=-1)    # (H, W, 3C)
    # dy handled on the output side: zero-row pad, one matmul, sum 3 row-shifted slabs.
    zrow = jnp.zeros((1, W, 3 * C), jnp.bfloat16)
    xpad = jnp.concatenate([zrow, xcat, zrow], axis=0)                  # (H+2, W, 3C)

    y = jnp.dot(xpad.reshape((H + 2) * W, 3 * C), w,
                preferred_element_type=jnp.float32)                     # ((H+2)*W, 3C) f32
    y = y.reshape(H + 2, W, 3 * C)
    out = (y[0:H, :, 0:C]
           + y[1:H + 1, :, C:2 * C]
           + y[2:H + 2, :, 2 * C:3 * C])                                # (H, W, C) f32
    return out + b                                                      # (1, C) bias broadcasts


def _resblock_kernel(x_ref, w1_ref, b1_ref, w2_ref, b2_ref, o_ref, *, H, W, C):
    # x_ref : (1, H, W, C)   input features (read once per batch element, at blk == 0)
    # w*_ref: (1, 3C, 3C)    this block's folded conv weights, bf16, streamed per grid step
    # b*_ref: (1, 1, C)      this block's conv biases, f32
    # o_ref : (1, H, W, C)   output block; constant index along the block axis => the f32
    #                        residual carry lives here (no extra VMEM scratch).
    blk = pl.program_id(1)

    @pl.when(blk == 0)
    def _init():
        o_ref[0] = x_ref[0].astype(o_ref.dtype)

    feat = o_ref[0].astype(jnp.float32)                                 # resident carry
    h = _conv3x3_fold(feat.astype(jnp.bfloat16), w1_ref[0], b1_ref[0], H=H, W=W, C=C)
    h = jnp.maximum(h, 0.0)                                             # ReLU (f32)
    h = _conv3x3_fold(h.astype(jnp.bfloat16), w2_ref[0], b2_ref[0], H=H, W=W, C=C)
    o_ref[0] = (feat + h).astype(o_ref.dtype)                           # residual, res_scale=1.0


def _fold_weights(w, C):
    """(NB, 3, 3, Cin, Cout) -> (NB, 3*Cin, 3*Cout) bf16: K = (kw, Cin), N = (kh, Cout)."""
    NB = w.shape[0]
    wr = w.reshape(NB, 3, 3 * C, C)                # (NB, kh, kw*Cin, Cout)
    wf = wr.transpose(0, 2, 1, 3).reshape(NB, 3 * C, 3 * C)
    return wf.astype(jnp.bfloat16)


def _vmem_limit_estimate(H, W, C):
    f32, bf16 = 4, 2
    fmap = H * W * C * f32
    io_bufs = 4 * fmap                                     # x (2 bufs) + out (2 bufs), f32
    weights = 2 * 2 * (3 * C) * (3 * C) * bf16             # w1 + w2, double-buffered, bf16
    im2col = (H + 2) * W * (3 * C) * (bf16 + f32)          # xpad (bf16) + y (f32)
    temps = 4 * fmap                                       # feat / h / slab temporaries, f32
    est = int((io_bufs + weights + im2col + temps) * 1.5) + (2 << 20)
    return max(min(est, 128 << 20), 32 << 20)


def residual_blocks_without_input_conv(feat, w1, b1, w2, b2, *, vmem_limit_bytes=None):
    """feat: (B, H, W, C) NHWC f32.  w1/w2: (NB, 3, 3, Cin, Cout).  b1/b2: (NB, 1, C)."""
    B, H, W, C = feat.shape
    NB = w1.shape[0]

    w1f = _fold_weights(w1, C)
    w2f = _fold_weights(w2, C)
    b1p = b1.reshape(NB, 1, C).astype(jnp.float32)
    b2p = b2.reshape(NB, 1, C).astype(jnp.float32)

    if vmem_limit_bytes is None:
        vmem_limit_bytes = _vmem_limit_estimate(H, W, C)

    kernel = functools.partial(_resblock_kernel, H=H, W=W, C=C)

    # NB must stay sequential (chained residual blocks); only B is "parallel" (megacore on v7x).
    return pl.pallas_call(
        kernel,
        out_shape=jax.ShapeDtypeStruct((B, H, W, C), feat.dtype),
        grid_spec=pltpu.PrefetchScalarGridSpec(
            num_scalar_prefetch=0,
            grid=(B, NB),
            in_specs=[
                pl.BlockSpec((1, H, W, C), lambda b, k: (b, 0, 0, 0)),       # x (constant over k)
                pl.BlockSpec((1, 3 * C, 3 * C), lambda b, k: (k, 0, 0)),     # w1[k] streamed
                pl.BlockSpec((1, 1, C), lambda b, k: (k, 0, 0)),             # b1[k]
                pl.BlockSpec((1, 3 * C, 3 * C), lambda b, k: (k, 0, 0)),     # w2[k] streamed
                pl.BlockSpec((1, 1, C), lambda b, k: (k, 0, 0)),             # b2[k]
            ],
            out_specs=pl.BlockSpec((1, H, W, C), lambda b, k: (b, 0, 0, 0)), # carry + output
        ),
        compiler_params=pltpu.CompilerParams(
            dimension_semantics=("parallel", "arbitrary"),
            vmem_limit_bytes=vmem_limit_bytes,
        ),
    )(feat, w1f, b1p, w2f, b2p)


def _reference_forward(feat, w1, b1, w2, b2):
    """Pure-JAX reference (lax.conv) matching the PyTorch semantics (f32 throughout)."""
    x = feat
    NB = w1.shape[0]
    dn = ("NHWC", "HWIO", "NHWC")
    for i in range(NB):
        h = jax.lax.conv_general_dilated(x, w1[i], (1, 1), "SAME", dimension_numbers=dn)
        h = h + b1[i].reshape(1, 1, 1, -1)
        h = jnp.maximum(h, 0.0)
        h = jax.lax.conv_general_dilated(h, w2[i], (1, 1), "SAME", dimension_numbers=dn)
        h = h + b2[i].reshape(1, 1, 1, -1)
        x = x + h
    return x


if __name__ == "__main__":
    # Small deterministic synthetic config (module defaults are 64 ch / 30 blocks).
    B, H, W, C = 2, 16, 16, 32
    NUM_BLOCKS = 3

    key = jax.random.PRNGKey(0)
    kx, kw1, kw2, kb1, kb2 = jax.random.split(key, 5)

    feat = jax.random.normal(kx, (B, H, W, C), jnp.float32)

    # Kaiming-style std scaled by 0.1, mimicking ResidualBlockNoBN's default init scale.
    std = math.sqrt(2.0 / (3 * 3 * C)) * 0.1
    w1 = jax.random.normal(kw1, (NUM_BLOCKS, 3, 3, C, C), jnp.float32) * std
    w2 = jax.random.normal(kw2, (NUM_BLOCKS, 3, 3, C, C), jnp.float32) * std
    b1 = jax.random.normal(kb1, (NUM_BLOCKS, 1, C), jnp.float32) * 0.01
    b2 = jax.random.normal(kb2, (NUM_BLOCKS, 1, C), jnp.float32) * 0.01

    out = residual_blocks_without_input_conv(feat, w1, b1, w2, b2)
    out = jax.block_until_ready(out)

    ref = jax.block_until_ready(_reference_forward(feat, w1, b1, w2, b2))
    assert out.shape == feat.shape and out.dtype == feat.dtype
    # Tolerance accounts for bf16 MXU operands (f32 accumulation); residual carry stays f32.
    assert jnp.allclose(out, ref, rtol=2e-2, atol=2e-3), "mismatch vs reference"

    print("KERNEL_OK")
</pallas_src>

<mosaic_0001>
module attributes {stable_mosaic.version = 11 : i64} {
  func.func @_resblock_kernel(%arg0: i32, %arg1: i32, %arg2: memref<1x16x16x32xf32, #tpu.memory_space<vmem>>, %arg3: memref<1x96x96xbf16, #tpu.memory_space<vmem>>, %arg4: memref<1x1x32xf32, #tpu.memory_space<vmem>>, %arg5: memref<1x96x96xbf16, #tpu.memory_space<vmem>>, %arg6: memref<1x1x32xf32, #tpu.memory_space<vmem>>, %arg7: memref<1x16x16x32xf32, #tpu.memory_space<vmem>>) attributes {dimension_semantics = [#tpu.dimension_semantics<parallel>, #tpu.dimension_semantics<arbitrary>], iteration_bounds = array<i64: 2, 3>, scalar_prefetch = 0 : i64, scratch_operands = 0 : i64, tpu.core_type = #tpu.core_type<tc>, window_params = [{transform_indices = @transform_0, window_bounds = array<i64: 1, 16, 16, 32>}, {transform_indices = @transform_1, window_bounds = array<i64: 1, 96, 96>}, {transform_indices = @transform_2, window_bounds = array<i64: 1, 1, 32>}, {transform_indices = @transform_3, window_bounds = array<i64: 1, 96, 96>}, {transform_indices = @transform_4, window_bounds = array<i64: 1, 1, 32>}, {transform_indices = @transform_5, window_bounds = array<i64: 1, 16, 16, 32>}]} {
    %c0_i32 = arith.constant 0 : i32
    %0 = arith.cmpi eq, %arg1, %c0_i32 : i32
    %1 = arith.extui %0 : i1 to i32
    %c0_i32_0 = arith.constant 0 : i32
    %2 = arith.cmpi ne, %1, %c0_i32_0 : i32
    scf.if %2 {
      %c0_26 = arith.constant 0 : index
      %c0_27 = arith.constant 0 : index
      %c0_28 = arith.constant 0 : index
      %c0_29 = arith.constant 0 : index
      %57 = vector.load %arg2[%c0_26, %c0_27, %c0_28, %c0_29] : memref<1x16x16x32xf32, #tpu.memory_space<vmem>>, vector<1x16x16x32xf32>
      %58 = vector.shape_cast %57 : vector<1x16x16x32xf32> to vector<16x16x32xf32>
      %c0_30 = arith.constant 0 : index
      %c0_31 = arith.constant 0 : index
      %c0_32 = arith.constant 0 : index
      %c0_33 = arith.constant 0 : index
      %59 = vector.load %arg7[%c0_30, %c0_31, %c0_32, %c0_33] : memref<1x16x16x32xf32, #tpu.memory_space<vmem>>, vector<1x16x16x32xf32>
      %60 = vector.shape_cast %59 : vector<1x16x16x32xf32> to vector<16x16x32xf32>
      %61 = vector.shape_cast %58 : vector<16x16x32xf32> to vector<1x16x16x32xf32>
      tpu.vector_store %arg7[%c0_30, %c0_31, %c0_32, %c0_33], %61 {strides = array<i32>} : memref<1x16x16x32xf32, #tpu.memory_space<vmem>>, vector<1x16x16x32xf32>,
    } else {
    }
    %c0 = arith.constant 0 : index
    %c0_1 = arith.constant 0 : index
    %c0_2 = arith.constant 0 : index
    %c0_3 = arith.constant 0 : index
    %3 = vector.load %arg7[%c0, %c0_1, %c0_2, %c0_3] : memref<1x16x16x32xf32, #tpu.memory_space<vmem>>, vector<1x16x16x32xf32>
    %4 = vector.shape_cast %3 : vector<1x16x16x32xf32> to vector<16x16x32xf32>
    %5 = arith.truncf %4 : vector<16x16x32xf32> to vector<16x16x32xbf16>
    %c0_4 = arith.constant 0 : index
    %c0_5 = arith.constant 0 : index
    %c0_6 = arith.constant 0 : index
    %6 = vector.load %arg3[%c0_4, %c0_5, %c0_6] : memref<1x96x96xbf16, #tpu.memory_space<vmem>>, vector<1x96x96xbf16>
    %7 = vector.shape_cast %6 : vector<1x96x96xbf16> to vector<96x96xbf16>
    %c0_7 = arith.constant 0 : index
    %c0_8 = arith.constant 0 : index
    %c0_9 = arith.constant 0 : index
    %8 = vector.load %arg4[%c0_7, %c0_8, %c0_9] : memref<1x1x32xf32, #tpu.memory_space<vmem>>, vector<1x1x32xf32>
    %9 = vector.shape_cast %8 : vector<1x1x32xf32> to vector<1x32xf32>
    %cst = arith.constant 0.000000e+00 : bf16
    %10 = vector.broadcast %cst : bf16 to vector<16x1x32xbf16>
    %11 = tpu.concatenate %10, %5, %10 in 1 : vector<16x1x32xbf16>, vector<16x16x32xbf16>, vector<16x1x32xbf16> -> vector<16x18x32xbf16>
    %12 = vector.extract_strided_slice %11 {offsets = [0, 0, 0], sizes = [16, 16, 32], strides = [1, 1, 1]} : vector<16x18x32xbf16> to vector<16x16x32xbf16>
    %13 = vector.extract_strided_slice %11 {offsets = [0, 2, 0], sizes = [16, 16, 32], strides = [1, 1, 1]} : vector<16x18x32xbf16> to vector<16x16x32xbf16>
    %14 = tpu.concatenate %12, %5, %13 in 2 : vector<16x16x32xbf16>, vector<16x16x32xbf16>, vector<16x16x32xbf16> -> vector<16x16x96xbf16>
    %cst_10 = arith.constant 0.000000e+00 : bf16
    %15 = vector.broadcast %cst_10 : bf16 to vector<1x16x96xbf16>
    %16 = tpu.concatenate %15, %14, %15 in 0 : vector<1x16x96xbf16>, vector<16x16x96xbf16>, vector<1x16x96xbf16> -> vector<18x16x96xbf16>
    %17 = vector.shape_cast %16 : vector<18x16x96xbf16> to vector<288x96xbf16>
    %cst_11 = arith.constant dense<0.000000e+00> : vector<288x96xf32>
    %18 = tpu.matmul %17, %7, %cst_11 {dimension_numbers = #tpu.dot_dimension_numbers<[1], [0], [0], [1], [0, 0, 1, 1], [], []>} : vector<288x96xbf16>, vector<96x96xbf16>, vector<288x96xf32> -> vector<288x96xf32>
    %19 = vector.shape_cast %18 : vector<288x96xf32> to vector<18x16x96xf32>
    %20 = vector.extract_strided_slice %19 {offsets = [0, 0, 0], sizes = [16, 16, 32], strides = [1, 1, 1]} : vector<18x16x96xf32> to vector<16x16x32xf32>
    %21 = vector.extract_strided_slice %19 {offsets = [1, 0, 32], sizes = [16, 16, 32], strides = [1, 1, 1]} : vector<18x16x96xf32> to vector<16x16x32xf32>
    %22 = arith.addf %20, %21 : vector<16x16x32xf32>
    %23 = vector.extract_strided_slice %19 {offsets = [2, 0, 64], sizes = [16, 16, 32], strides = [1, 1, 1]} : vector<18x16x96xf32> to vector<16x16x32xf32>
    %24 = arith.addf %22, %23 : vector<16x16x32xf32>
    %25 = vector.shape_cast %9 : vector<1x32xf32> to vector<1x1x32xf32>
    %26 = vector.broadcast %25 : vector<1x1x32xf32> to vector<16x16x32xf32>
    %27 = arith.addf %24, %26 : vector<16x16x32xf32>
    %cst_12 = arith.constant 0.000000e+00 : f32
    %28 = vector.broadcast %cst_12 : f32 to vector<16x16x32xf32>
    %29 = arith.maximumf %27, %28 : vector<16x16x32xf32>
    %30 = arith.truncf %29 : vector<16x16x32xf32> to vector<16x16x32xbf16>
    %c0_13 = arith.constant 0 : index
    %c0_14 = arith.constant 0 : index
    %c0_15 = arith.constant 0 : index
    %31 = vector.load %arg5[%c0_13, %c0_14, %c0_15] : memref<1x96x96xbf16, #tpu.memory_space<vmem>>, vector<1x96x96xbf16>
    %32 = vector.shape_cast %31 : vector<1x96x96xbf16> to vector<96x96xbf16>
    %c0_16 = arith.constant 0 : index
    %c0_17 = arith.constant 0 : index
    %c0_18 = arith.constant 0 : index
    %33 = vector.load %arg6[%c0_16, %c0_17, %c0_18] : memref<1x1x32xf32, #tpu.memory_space<vmem>>, vector<1x1x32xf32>
    %34 = vector.shape_cast %33 : vector<1x1x32xf32> to vector<1x32xf32>
    %cst_19 = arith.constant 0.000000e+00 : bf16
    %35 = vector.broadcast %cst_19 : bf16 to vector<16x1x32xbf16>
    %36 = tpu.concatenate %35, %30, %35 in 1 : vector<16x1x32xbf16>, vector<16x16x32xbf16>, vector<16x1x32xbf16> -> vector<16x18x32xbf16>
    %37 = vector.extract_strided_slice %36 {offsets = [0, 0, 0], sizes = [16, 16, 32], strides = [1, 1, 1]} : vector<16x18x32xbf16> to vector<16x16x32xbf16>
    %38 = vector.extract_strided_slice %36 {offsets = [0, 2, 0], sizes = [16, 16, 32], strides = [1, 1, 1]} : vector<16x18x32xbf16> to vector<16x16x32xbf16>
    %39 = tpu.concatenate %37, %30, %38 in 2 : vector<16x16x32xbf16>, vector<16x16x32xbf16>, vector<16x16x32xbf16> -> vector<16x16x96xbf16>
    %cst_20 = arith.constant 0.000000e+00 : bf16
    %40 = vector.broadcast %cst_20 : bf16 to vector<1x16x96xbf16>
    %41 = tpu.concatenate %40, %39, %40 in 0 : vector<1x16x96xbf16>, vector<16x16x96xbf16>, vector<1x16x96xbf16> -> vector<18x16x96xbf16>
    %42 = vector.shape_cast %41 : vector<18x16x96xbf16> to vector<288x96xbf16>
    %cst_21 = arith.constant dense<0.000000e+00> : vector<288x96xf32>
    %43 = tpu.matmul %42, %32, %cst_21 {dimension_numbers = #tpu.dot_dimension_numbers<[1], [0], [0], [1], [0, 0, 1, 1], [], []>} : vector<288x96xbf16>, vector<96x96xbf16>, vector<288x96xf32> -> vector<288x96xf32>
    %44 = vector.shape_cast %43 : vector<288x96xf32> to vector<18x16x96xf32>
    %45 = vector.extract_strided_slice %44 {offsets = [0, 0, 0], sizes = [16, 16, 32], strides = [1, 1, 1]} : vector<18x16x96xf32> to vector<16x16x32xf32>
    %46 = vector.extract_strided_slice %44 {offsets = [1, 0, 32], sizes = [16, 16, 32], strides = [1, 1, 1]} : vector<18x16x96xf32> to vector<16x16x32xf32>
    %47 = arith.addf %45, %46 : vector<16x16x32xf32>
    %48 = vector.extract_strided_slice %44 {offsets = [2, 0, 64], sizes = [16, 16, 32], strides = [1, 1, 1]} : vector<18x16x96xf32> to vector<16x16x32xf32>
    %49 = arith.addf %47, %48 : vector<16x16x32xf32>
    %50 = vector.shape_cast %34 : vector<1x32xf32> to vector<1x1x32xf32>
    %51 = vector.broadcast %50 : vector<1x1x32xf32> to vector<16x16x32xf32>
    %52 = arith.addf %49, %51 : vector<16x16x32xf32>
    %53 = arith.addf %4, %52 : vector<16x16x32xf32>
    %c0_22 = arith.constant 0 : index
    %c0_23 = arith.constant 0 : index
    %c0_24 = arith.constant 0 : index
    %c0_25 = arith.constant 0 : index
    %54 = vector.load %arg7[%c0_22, %c0_23, %c0_24, %c0_25] : memref<1x16x16x32xf32, #tpu.memory_space<vmem>>, vector<1x16x16x32xf32>
    %55 = vector.shape_cast %54 : vector<1x16x16x32xf32> to vector<16x16x32xf32>
    %56 = vector.shape_cast %53 : vector<16x16x32xf32> to vector<1x16x16x32xf32>
    tpu.vector_store %arg7[%c0_22, %c0_23, %c0_24, %c0_25], %56 {strides = array<i32>} : memref<1x16x16x32xf32, #tpu.memory_space<vmem>>, vector<1x16x16x32xf32>,
    return
  }
  func.func @transform_0(%arg0: i32, %arg1: i32) -> (i32, i32, i32, i32) {
    %c0_i32 = arith.constant 0 : i32
    %c0_i32_0 = arith.constant 0 : i32
    %c0_i32_1 = arith.constant 0 : i32
    %c0_i32_2 = arith.constant 0 : i32
    return %arg0, %c0_i32, %c0_i32_0, %c0_i32_1 : i32, i32, i32, i32
  }
  func.func @transform_1(%arg0: i32, %arg1: i32) -> (i32, i32, i32) {
    %c0_i32 = arith.constant 0 : i32
    %c0_i32_0 = arith.constant 0 : i32
    %c0_i32_1 = arith.constant 0 : i32
    return %arg1, %c0_i32, %c0_i32_0 : i32, i32, i32
  }
  func.func @transform_2(%arg0: i32, %arg1: i32) -> (i32, i32, i32) {
    %c0_i32 = arith.constant 0 : i32
    %c0_i32_0 = arith.constant 0 : i32
    %c0_i32_1 = arith.constant 0 : i32
    return %arg1, %c0_i32, %c0_i32_0 : i32, i32, i32
  }
  func.func @transform_3(%arg0: i32, %arg1: i32) -> (i32, i32, i32) {
    %c0_i32 = arith.constant 0 : i32
    %c0_i32_0 = arith.constant 0 : i32
    %c0_i32_1 = arith.constant 0 : i32
    return %arg1, %c0_i32, %c0_i32_0 : i32, i32, i32
  }
  func.func @transform_4(%arg0: i32, %arg1: i32) -> (i32, i32, i32) {
    %c0_i32 = arith.constant 0 : i32
    %c0_i32_0 = arith.constant 0 : i32
    %c0_i32_1 = arith.constant 0 : i32
    return %arg1, %c0_i32, %c0_i32_0 : i32, i32, i32
  }
  func.func @transform_5(%arg0: i32, %arg1: i32) -> (i32, i32, i32, i32) {
    %c0_i32 = arith.constant 0 : i32
    %c0_i32_0 = arith.constant 0 : i32
    %c0_i32_1 = arith.constant 0 : i32
    %c0_i32_2 = arith.constant 0 : i32
    return %arg0, %c0_i32, %c0_i32_0, %c0_i32_1 : i32, i32, i32, i32
  }
}

</mosaic_0001>

<bundles_post_ra>
// kernel: tpu_custom_call.1
= control target key start
LH: loop header
LB: loop body
LE: loop exit
PB: predicated region body
PF: predicated region fallthrough
CT: control target
= control target key end

     0   :  { %s5068_s0 = inlined_call_operand.hbm [shape: f32[2,16,16,32], index: 0, kind: input, shape index: {}]   ;;  %s5069_s1 = inlined_call_operand.hbm [shape: bf16[3,96,96], index: 1, kind: input, shape index: {}]   ;;  %s5070_s2 = inlined_call_operand.vmem [shape: f32[3,1,32], index: 2, kind: input, shape index: {}]   ;;  %s5071_s3 = inlined_call_operand.hbm [shape: bf16[3,96,96], index: 3, kind: input, shape index: {}]   ;;  %s5072_s4 = inlined_call_operand.vmem [shape: f32[3,1,32], index: 4, kind: input, shape index: {}]   ;;  %s5073_s5 = inlined_call_operand.hbm [shape: f32[2,16,16,32], index: 5, kind: output, shape index: {}]  }
   0x1   :  { %5088 = sst [smem:[#allocation19_spill]] %s5068_s0 }
   0x2   :  { %5089 = sst [smem:[#allocation20_spill]] %s5069_s1 }
   0x3   :  { %5090 = sst [smem:[#allocation21_spill]] %s5072_s4 }
   0x4   :  { %5091 = sst [smem:[#allocation22_spill]] %s5073_s5 }
   0x5   :  { %10 = vsyncpa [#allocation3], 0 }
   0x6   :  { %12 = vsyncpa [#allocation3 + $0x1], 0 }
   0x7   :  { %13 = vsyncpa [#allocation6], 0 }
   0x8   :  { %15 = vsyncpa [#allocation6 + $0x1], 0 }
   0x9   :  { %16 = vsyncpa [#allocation4], 0 }
   0xa   :  { %18 = vsyncpa [#allocation4 + $0x1], 0  ;;  %s3406_s18 = smov 0   ;;  %s3408_s19 = smov 0  }
   0xb   :  { %s3410_s20 = smov 0   ;;  %s3412_s21 = smov 0  }
   0xc   :  { %s3414_s22 = smov 0   ;;  %s3416_s23 = smov 0  }
   0xd   :  { %s3418_s24 = smov 0   ;;  %s3420_s25 = smov 0  }
   0xe   :  { %s3422_s26 = smov 0   ;;  %s3424_s27 = smov 0  }
   0xf   :  { %s3426_s28 = smov 0  }
  0x10 LB: > { %5092 = sst [smem:[#allocation12_spill]] %s3328_s20  ;;  %s33_s29 = sadd.s32 1, %s3352_s26  ;;  %s3360_s28 = sphi %s3426_s28, %s24_s28   ;;  %s3356_s27 = sphi %s3424_s27, %s5134_s27   ;;  %s3352_s26 = sphi %s3422_s26, %s5141_s26   ;;  %s3348_s25 = sphi %s3420_s25, %s5132_s25   ;;  %s3344_s24 = sphi %s3418_s24, %s5140_s24   ;;  %s3340_s23 = sphi %s3416_s23, %s5139_s23   ;;  %s3336_s22 = sphi %s3414_s22, %s5138_s22   ;;  %s3332_s21 = sphi %s3412_s21, %s5137_s21   ;;  %s3328_s20 = sphi %s3410_s20, %s5130_s20   ;;  %s3324_s19 = sphi %s3408_s19, %s5136_s19   ;;  %s3320_s18 = sphi %s3406_s18, %s5135_s18  }
  0x11   : > { %5093 = sst [smem:[#allocation13_spill]] %s3348_s25  ;;  %p5077_p0 = scmp.eq.s32.totalorder %s3360_s28, 0 }
  0x12   : > { %5094 = sst [smem:[#allocation14_spill]] %s3356_s27  ;;  %p3463_p1 = scmp.ge.s32.totalorder %s33_s29, 3 }
  0x13   : > { %s69_s6 = sadd.s32 1, %s3328_s20  ;;  %p76_p2 = scmp.ne.s32.totalorder %s3328_s20, %s3324_s19 }
  0x14   : > { %s5143_s29 = smov (%p3463_p1, %s33_s29), 0  ;;  %p5076_p5 = scmp.lt.s32.totalorder %s3360_s28, 6 }
  0x15   : > { %5096 = sst [smem:[#allocation15_spill]] %s5143_s29  ;;  %p78_p4 = por %p76_p2, %p5077_p0 }
  0x16   : > { %s66_s7 = ssub.s32 %s3352_s26, %s5143_s29  ;;  %s231_s8 = sand.u32 1, %s3360_s28  }
  0x17   : > { %p67_p6 = scmp.eq.s32.totalorder %s66_s7, 0  ;;  %s233_s9 = sand.u32 1, %s3328_s20  }
  0x18   : > { %s3486_s11 = smul.u32 48, %s233_s9  ;;  %p3490_p7 = pnand %p5076_p5, %p78_p4 }
  0x19   : > { %s3484_s10 = scalar_select %p67_p6, %s3328_s20, %s69_s6  }
  0x1a   : > { %s5074_s13 = smul.u32 768, %s3352_s26  ;;  %s5099_s1 = sld [smem:[#allocation20_spill]] }
  0x1b   : > { %5097 = sst [smem:[#allocation16_spill]] %s3484_s10  ;;  %s235_s17 = scalar_lea.vmem [#allocation5], %s3486_s11 }
  0x1c   : > { %s242_s6 = sshll.u32 %s235_s17, 4  ;;  %s3505_s7 = scalar_lea.sflag [#allocation6], %s231_s8  ;;  %s3503_s6 = int_to_ptr.vmem [resolvable:$true] %s242_s6 }
  0x1d   : > { %p5078_p9 = pneg %p3490_p7 }
  0x20   : > { %s3500_s16 = scalar_lea.hbm %s5099_s1, %s5074_s13  ;;  %s3149_s13 = scalar_lea.hbm %s5099_s1, 2304 }
  0x21   : > { %s3144_s9 = scalar_lea.hbm %s3500_s16, 768  ;;  %p3150_p12 = scmp.lt.u32.totalorder %s3500_s16, %s5099_s1 }
  0x22   : > { %p3145_p8 = scmp.ne.s32.totalorder %s3500_s16, %s3144_s9  ;;  %p3151_p13 = scmp.lt.u32.totalorder %s3149_s13, %s3144_s9 }
  0x23   : > { %p3153_p4 = scmp.lt.u32.totalorder %s3144_s9, %s3500_s16 }
  0x24   : > { %p3147_p10 = pnand %p5078_p9, %p3145_p8  ;;  %p3152_p2 = por %p3151_p13, %p3150_p12 }
  0x26   : > { %p3148_p11 = pneg %p3147_p10  ;;  %p3154_p6 = por %p3153_p4, %p3152_p2 }
  0x28   : > { %p3155_p5 = pnand %p3154_p6, %p3148_p11 }
  0x2a   : > { %3158 = shalt.err (!%p3155_p5)
}
  0x2b   : > { %s3159_s8 = scalar_lea.vmem %s3503_s6, 768  ;;  %s3362_s17 = smov [#allocation5]  }
  0x2c   : > { %p3160_p8 = scmp.ne.s32.totalorder %s3503_s6, %s3159_s8  ;;  %s3164_s14 = sshll.u32 %s3362_s17, 4  ;;  %s3165_s14 = int_to_ptr.vmem [resolvable:$false] %s3164_s14 }
  0x2d   : > { %s3166_s29 = scalar_lea.vmem %s3165_s14, 1536  ;;  %p3167_p0 = scmp.lt.s32.totalorder %s3503_s6, %s3165_s14 }
  0x2e   : > { %p3162_p10 = pnand %p3160_p8, %p5078_p9  ;;  %p3168_p12 = scmp.lt.s32.totalorder %s3166_s29, %s3159_s8 }
  0x30   : > { %p3163_p3 = pneg %p3162_p10  ;;  %p3169_p13 = por %p3168_p12, %p3167_p0 }
  0x32   : > { %p3170_p2 = pnand %p3169_p13, %p3163_p3 }
  0x34   : > { %3173 = shalt.err (!%p3170_p2)
}
  0x35   : > { %s5079_s10 = smov 64   ;;  %s5080_s13 = smov 4  }
  0x36   : > { %2992 = dma.hbm_to_vmem [thread:$0]  (!%p3490_p7), %s3500_s16, 768, %s3503_s6, %s3505_s7, %s5079_s10, %s5079_s10, %s5080_s13  }
  0x37   : > { %p2772_p0 = scmp.ge.s32.totalorder %s3360_s28, 1  ;;  %p283_p3 = scmp.lt.s32.totalorder %s3360_s28, 7 }
  0x38   : > { %s3543_s15 = sadd.s32 4294967295, %s3360_s28   ;;  %s2764_s8 = sadd.s32 4294967294, %s3360_s28  }
  0x39   : > { %p3538_p5 = pnand %p2772_p0, %p283_p3  ;;  %s36_s17 = sadd.s32 1, %s3356_s27 }
  0x3a   : > { %s5145_s17 = smov (!%p3463_p1, %s36_s17), %s3356_s27  ;;  %s43_s16 = sadd.s32 1, %s3340_s23 }
  0x3b   : > { %s5100_s9 = scalar_select %p3538_p5, 1, 0 }
  0x3c   : > { %p50_p11 = scmp.ne.s32.totalorder %s3340_s23, %s3336_s22  ;;  %p38_p4 = scmp.ge.s32.totalorder %s5145_s17, 2 }
  0x3d   : > { %p56_p6 = scmp.ne.s32.totalorder %s3336_s22, %s3332_s21  ;;  %p5101_p8 = scmp.eq.s32.totalorder %s3360_s28, 0 }
  0x3e   : > { %p57_p12 = scmp.eq.s32.totalorder %s3543_s15, 0  ;;  %s5147_s17 = smov (%p38_p4, %s5145_s17), 0 }
  0x3f   : > { %p3557_p10 = por %p5101_p8, %p50_p11  ;;  %5103 = sst [smem:[#allocation17_spill]] %s5147_s17 }
  0x40   : > { %p3567_p1 = por %p57_p12, %p56_p6  ;;  %p5105_p13 = scmp.ne.s32.totalorder %s3324_s19, %s3320_s18 }
  0x41   : > { %s40_s29 = ssub.s32 %s3356_s27, %s5147_s17  ;;  %p184_p0 = scmp.eq.s32.totalorder %s3543_s15, 5 }
  0x42   : > { %s5104_s30 = scalar_select %p3567_p1, 1, 0 }
  0x43   : > { %p3574_p2 = por %p5105_p13, %p57_p12  ;;  %p41_p3 = scmp.eq.s32.totalorder %s40_s29, 0 }
  0x44   : > { %p190_p8 = scmp.eq.s32.totalorder %s2764_s8, 5  ;;  %p3581_p9 = por %p184_p0, %p50_p11 }
  0x45   : > { %s5106_s14 = scalar_select %p3574_p2, 1, 0 }
  0x46   : > { %s5107_s10 = scalar_select %p3581_p9, 1, 0 }
  0x47   : > { %s210_s13 = sand.u32 1, %s3340_s23   ;;  %p3592_p4 = por %p190_p8, %p56_p6 }
  0x48   : > { %s3587_s1 = scalar_select %p41_p3, %s3340_s23, %s43_s16  }
  0x49   : > { %s5109_s20 = scalar_select %p3592_p4, 1, 0 }
  0x4a   : > { %5108 = sst [smem:[#allocation18_spill]] %s3587_s1  ;;  %s2767_s18 = sshll.u32 %s210_s13, 8 }
  0x4b   : > { %s2827_s5 = sshll.u32 %s3356_s27, 12  ;;  %s5110_s0 = sld [smem:[#allocation19_spill]] }
  0x4c   : > { %s214_s8 = scalar_lea.vmem [#allocation2], %s2767_s18  ;;  %p5111_p11 = scmp.lt.s32.totalorder %s3360_s28, 6 }
  0x4d   : > { %s221_s29 = sshll.u32 %s214_s8, 4  ;;  %s3612_s27 = scalar_lea.sflag [#allocation3], %s210_s13  ;;  %s3610_s29 = int_to_ptr.vmem [resolvable:$true] %s221_s29 }
  0x4e   : > { %p3606_p12 = pnand %p5111_p11, %p3557_p10 }
  0x50   : > { %p3176_p13 = pneg %p3606_p12 }
  0x51   : > { %s3600_s17 = scalar_lea.hbm %s5110_s0, %s2827_s5  ;;  %s3179_s6 = scalar_lea.hbm %s5110_s0, 8192 }
  0x52   : > { %s3174_s4 = scalar_lea.hbm %s3600_s17, 4096  ;;  %p3180_p10 = scmp.lt.u32.totalorder %s3600_s17, %s5110_s0 }
  0x53   : > { %p3175_p6 = scmp.ne.s32.totalorder %s3600_s17, %s3174_s4  ;;  %p3181_p8 = scmp.lt.u32.totalorder %s3179_s6, %s3174_s4 }
  0x54   : > { %p3183_p4 = scmp.lt.u32.totalorder %s3174_s4, %s3600_s17 }
  0x55   : > { %p3177_p0 = pnand %p3176_p13, %p3175_p6  ;;  %p3182_p11 = por %p3181_p8, %p3180_p10 }
  0x57   : > { %p3178_p3 = pneg %p3177_p0  ;;  %p3184_p9 = por %p3183_p4, %p3182_p11 }
  0x59   : > { %p3185_p2 = pnand %p3184_p9, %p3178_p3 }
  0x5b   : > { %3188 = shalt.err (!%p3185_p2)
}
  0x5c   : > { %s3189_s13 = scalar_lea.vmem %s3610_s29, 4096  ;;  %s3365_s5 = smov [#allocation2]  }
  0x5d   : > { %p3190_p6 = scmp.ne.s32.totalorder %s3610_s29, %s3189_s13  ;;  %s3194_s25 = sshll.u32 %s3365_s5, 4  ;;  %s3195_s25 = int_to_ptr.vmem [resolvable:$false] %s3194_s25 }
  0x5e   : > { %s3196_s18 = scalar_lea.vmem %s3195_s25, 8192  ;;  %p3197_p5 = scmp.lt.s32.totalorder %s3610_s29, %s3195_s25 }
  0x5f   : > { %p3192_p0 = pnand %p3190_p6, %p3176_p13  ;;  %p3198_p10 = scmp.lt.s32.totalorder %s3196_s18, %s3189_s13 }
  0x61   : > { %p3193_p1 = pneg %p3192_p0  ;;  %p3199_p8 = por %p3198_p10, %p3197_p5 }
  0x63   : > { %p3200_p4 = pnand %p3199_p8, %p3193_p1 }
  0x65   : > { %3203 = shalt.err (!%p3200_p4)
}
  0x66   : > { %s3366_s4 = smov 128   ;;  %s3367_s6 = smov 8  }
  0x67   : > { %2989 = dma.hbm_to_vmem [thread:$0]  (!%p3606_p12), %s3600_s17, 4096, %s3610_s29, %s3612_s27, %s3366_s4, %s3366_s4, %s3367_s6  }
  0x68   : > { %s5113_s8 = smul.u32 768, %s3352_s26  ;;  %s262_s13 = scalar_lea.vmem [#allocation7], %s3486_s11 }
  0x69   : > { %s269_s18 = sshll.u32 %s262_s13, 4  ;;  %p5114_p5 = pneg %p3490_p7  ;;  %s3648_s18 = int_to_ptr.vmem [resolvable:$true] %s269_s18 }
  0x6a   : > { %s3645_s25 = scalar_lea.hbm %s5071_s3, %s5113_s8  ;;  %s3209_s0 = scalar_lea.hbm %s5071_s3, 2304 }
  0x6b   : > { %s3204_s1 = scalar_lea.hbm %s3645_s25, 768  ;;  %p3210_p12 = scmp.lt.u32.totalorder %s3645_s25, %s5071_s3 }
  0x6c   : > { %p3205_p9 = scmp.ne.s32.totalorder %s3645_s25, %s3204_s1  ;;  %p3211_p13 = scmp.lt.u32.totalorder %s3209_s0, %s3204_s1 }
  0x6d   : > { %p3213_p11 = scmp.lt.u32.totalorder %s3204_s1, %s3645_s25 }
  0x6e   : > { %p3207_p1 = pnand %p3205_p9, %p5114_p5  ;;  %p3212_p3 = por %p3211_p13, %p3210_p12 }
  0x70   : > { %p3208_p2 = pneg %p3207_p1  ;;  %p3214_p6 = por %p3213_p11, %p3212_p3 }
  0x72   : > { %p3215_p0 = pnand %p3214_p6, %p3208_p2 }
  0x74   : > { %3218 = shalt.err (!%p3215_p0)
}
  0x75   : > { %s3219_s11 = scalar_lea.vmem %s3648_s18, 768  ;;  %p5115_p8 = pmov %p5114_p5 }
  0x76   : > { %p3220_p10 = scmp.ne.s32.totalorder %s3648_s18, %s3219_s11  ;;  %s3368_s4 = smov [#allocation7]  }
  0x77   : > { %s3224_s6 = sshll.u32 %s3368_s4, 4  ;;  %s3225_s6 = int_to_ptr.vmem [resolvable:$false] %s3224_s6 }
  0x78   : > { %p3222_p4 = pnand %p3220_p10, %p5115_p8  ;;  %s3226_s8 = scalar_lea.vmem %s3225_s6, 1536 }
  0x79   : > { %p3227_p5 = scmp.lt.s32.totalorder %s3648_s18, %s3225_s6  ;;  %p3228_p1 = scmp.lt.s32.totalorder %s3226_s8, %s3219_s11 }
  0x7a   : > { %p3223_p9 = pneg %p3222_p4 }
  0x7b   : > { %p3229_p12 = por %p3228_p1, %p3227_p5 }
  0x7d   : > { %p3230_p13 = pnand %p3229_p12, %p3223_p9 }
  0x7f   : > { %3233 = shalt.err (!%p3230_p13)
}
  0x80   : > { %s5116_s1 = smov 4   ;;  %s5117_s5 = smov 64  }
  0x81   : > { %2995 = dma.hbm_to_vmem [thread:$0]  (!%p3490_p7), %s3645_s25, 768, %s3648_s18, %s3505_s7, %s5117_s5, %s5117_s5, %s5116_s1  }
  0x82   : > { %p5118_p2 = scmp.ne.s32.totalorder %s5100_s9, 0 }
  0x83   : > { %s3680_s13 = sand.u32 (!%p5118_p2), 1, %s3336_s22   ;;  %p5119_p3 = scmp.ne.s32.totalorder (!%p5118_p2), %s5104_s30, 0 }
  0x84   : > { %287 = sbr.rel (%p5118_p2) target bundleno = 1261 (0x4ed), region = 40  ;;  %s2773_s27 = sshll.u32 (!%p5118_p2), %s3680_s13, 8 }
  0x85   : > { %s290_s17 = scalar_lea.sflag (!%p5118_p2), [#allocation3], %s3680_s13  ;;  %s3684_s0 = scalar_lea.vmem (!%p5118_p2), [#allocation2], %s2773_s27 }
  0x8b   : > { %3307 = dma.done.wait (%p5119_p3), %s290_s17, 4096  }
  0x8c   : > { %3309 = vsyncadd (%p5119_p3), %s290_s17, 4294963200  ;;  %s298_s12 = sand.u32 1, %s3543_s15   ;;  %s300_s7 = sand.u32 1, %s3324_s19  }
  0x8d   : > { %s2977_s9 = smul.u32 48, %s300_s7  ;;  %s299_s25 = scalar_lea.sflag [#allocation6], %s298_s12 }
  0x8e   : > { %p5120_p7 = scmp.ne.s32.totalorder %s5106_s14, 0 }
  0x8f   : > { %s3692_s18 = scalar_lea.vmem [#allocation5], %s2977_s9 }
  0x90   : > { %3311 = dma.done.wait (%p5120_p7), %s299_s25, 1536  }
  0x91   : > { %3313 = vsyncadd (%p5120_p7), %s299_s25, 4294965760  ;;  %p354_p11 = scmp.lt.s32.totalorder %s3344_s24, 2  ;;  %s5121_s6 = sld [smem:[#allocation21_spill]] }
  0x92   : > { %s3710_s1 = scalar_lea.vmem [#allocation7], %s2977_s9  ;;  %s3712_s5 = scalar_lea.vmem [#allocation8], %s2773_s27 }
  0x93   : > { %s3700_s29 = scalar_select %p354_p11, %s3344_s24, 2 }
  0x94   : > { %p2775_p6 = scmp.ne.s32.totalorder %s3344_s24, 0 }
  0x95   : > { %s356_s15 = scalar_lea.vmem %s5070_s2, %s3700_s29  ;;  %v365_v0 = vld [vmem:[%s3684_s0] sm:$0xff] (!%p2775_p6)  ;;  %vm397_vm0 = vcmask (!%p2775_p6), 261120   ;;  %v366_v1 = vld [vmem:[%s3684_s0 + $0x8] sm:$0xff] (!%p2775_p6)  ;;  %v367_v2 = vld [vmem:[%s3684_s0 + $0x10] sm:$0xff] (!%p2775_p6) }
  0x96   : > { %364 = sbr.rel (%p2775_p6) target bundleno = 166 (0xa6), region = 56  ;;  %398 = vst.msk [vmem:[%s3712_s5] sm:$0xff] (!%p2775_p6), %vm397_vm0, %v365_v0  ;;  %399 = vst.msk [vmem:[%s3712_s5 + $0x8] sm:$0xff] (!%p2775_p6), %vm397_vm0, %v366_v1  ;;  %v368_v3 = vld [vmem:[%s3684_s0 + $0x18] sm:$0xff] (!%p2775_p6)  ;;  %v369_v4 = vld [vmem:[%s3684_s0 + $0x20] sm:$0xff] (!%p2775_p6) }
  0x97   : > { %s359_s8 = scalar_lea.vmem %s5121_s6, %s3700_s29  ;;  %400 = vst.msk [vmem:[%s3712_s5 + $0x10] sm:$0xff] (!%p2775_p6), %vm397_vm0, %v367_v2  ;;  %v370_v5 = vld [vmem:[%s3684_s0 + $0x28] sm:$0xff] (!%p2775_p6)  ;;  %401 = vst.msk [vmem:[%s3712_s5 + $0x18] sm:$0xff] (!%p2775_p6), %vm397_vm0, %v368_v3  ;;  %v371_v6 = vld [vmem:[%s3684_s0 + $0x30] sm:$0xff] (!%p2775_p6) }
  0x98   : > { %402 = vst.msk [vmem:[%s3712_s5 + $0x20] sm:$0xff] (!%p2775_p6), %vm397_vm0, %v369_v4  ;;  %403 = vst.msk [vmem:[%s3712_s5 + $0x28] sm:$0xff] (!%p2775_p6), %vm397_vm0, %v370_v5  ;;  %v372_v7 = vld [vmem:[%s3684_s0 + $0x38] sm:$0xff] (!%p2775_p6)  ;;  %v373_v8 = vld [vmem:[%s3684_s0 + $0x40] sm:$0xff] (!%p2775_p6) }
  0x99   : > { %404 = vst.msk [vmem:[%s3712_s5 + $0x30] sm:$0xff] (!%p2775_p6), %vm397_vm0, %v371_v6  ;;  %405 = vst.msk [vmem:[%s3712_s5 + $0x38] sm:$0xff] (!%p2775_p6), %vm397_vm0, %v372_v7  ;;  %v374_v9 = vld [vmem:[%s3684_s0 + $0x48] sm:$0xff] (!%p2775_p6)  ;;  %v375_v10 = vld [vmem:[%s3684_s0 + $0x50] sm:$0xff] (!%p2775_p6) }
  0x9a   : > { %406 = vst.msk [vmem:[%s3712_s5 + $0x40] sm:$0xff] (!%p2775_p6), %vm397_vm0, %v373_v8  ;;  %v376_v11 = vld [vmem:[%s3684_s0 + $0x58] sm:$0xff] (!%p2775_p6)  ;;  %407 = vst.msk [vmem:[%s3712_s5 + $0x48] sm:$0xff] (!%p2775_p6), %vm397_vm0, %v374_v9  ;;  %v377_v12 = vld [vmem:[%s3684_s0 + $0x60] sm:$0xff] (!%p2775_p6) }
  0x9b   : > { %408 = vst.msk [vmem:[%s3712_s5 + $0x50] sm:$0xff] (!%p2775_p6), %vm397_vm0, %v375_v10  ;;  %409 = vst.msk [vmem:[%s3712_s5 + $0x58] sm:$0xff] (!%p2775_p6), %vm397_vm0, %v376_v11  ;;  %v378_v13 = vld [vmem:[%s3684_s0 + $0x68] sm:$0xff] (!%p2775_p6)  ;;  %v379_v14 = vld [vmem:[%s3684_s0 + $0x70] sm:$0xff] (!%p2775_p6) }
  0x9c   : > { %410 = vst.msk [vmem:[%s3712_s5 + $0x60] sm:$0xff] (!%p2775_p6), %vm397_vm0, %v377_v12  ;;  %411 = vst.msk [vmem:[%s3712_s5 + $0x68] sm:$0xff] (!%p2775_p6), %vm397_vm0, %v378_v13  ;;  %v380_v15 = vld [vmem:[%s3684_s0 + $0x78] sm:$0xff] (!%p2775_p6)  ;;  %v381_v16 = vld [vmem:[%s3684_s0 + $0x80] sm:$0xff] (!%p2775_p6) }
  0x9d   : > { %412 = vst.msk [vmem:[%s3712_s5 + $0x70] sm:$0xff] %vm397_vm0, %v379_v14  ;;  %v382_v17 = vld [vmem:[%s3684_s0 + $0x88] sm:$0xff]  ;;  %413 = vst.msk [vmem:[%s3712_s5 + $0x78] sm:$0xff] %vm397_vm0, %v380_v15  ;;  %v383_v18 = vld [vmem:[%s3684_s0 + $0x90] sm:$0xff] }
  0x9e   : > { %414 = vst.msk [vmem:[%s3712_s5 + $0x80] sm:$0xff] %vm397_vm0, %v381_v16  ;;  %415 = vst.msk [vmem:[%s3712_s5 + $0x88] sm:$0xff] %vm397_vm0, %v382_v17  ;;  %v384_v19 = vld [vmem:[%s3684_s0 + $0x98] sm:$0xff]  ;;  %v385_v20 = vld [vmem:[%s3684_s0 + $0xa0] sm:$0xff] }
  0x9f   : > { %416 = vst.msk [vmem:[%s3712_s5 + $0x90] sm:$0xff] %vm397_vm0, %v383_v18  ;;  %417 = vst.msk [vmem:[%s3712_s5 + $0x98] sm:$0xff] %vm397_vm0, %v384_v19  ;;  %v386_v21 = vld [vmem:[%s3684_s0 + $0xa8] sm:$0xff]  ;;  %v387_v22 = vld [vmem:[%s3684_s0 + $0xb0] sm:$0xff] }
  0xa0   : > { %418 = vst.msk [vmem:[%s3712_s5 + $0xa0] sm:$0xff] %vm397_vm0, %v385_v20  ;;  %v388_v23 = vld [vmem:[%s3684_s0 + $0xb8] sm:$0xff]  ;;  %419 = vst.msk [vmem:[%s3712_s5 + $0xa8] sm:$0xff] %vm397_vm0, %v386_v21  ;;  %v389_v24 = vld [vmem:[%s3684_s0 + $0xc0] sm:$0xff] }
  0xa1   : > { %420 = vst.msk [vmem:[%s3712_s5 + $0xb0] sm:$0xff] %vm397_vm0, %v387_v22  ;;  %421 = vst.msk [vmem:[%s3712_s5 + $0xb8] sm:$0xff] %vm397_vm0, %v388_v23  ;;  %v390_v25 = vld [vmem:[%s3684_s0 + $0xc8] sm:$0xff]  ;;  %v391_v26 = vld [vmem:[%s3684_s0 + $0xd0] sm:$0xff] }
  0xa2   : > { %422 = vst.msk [vmem:[%s3712_s5 + $0xc0] sm:$0xff] %vm397_vm0, %v389_v24  ;;  %423 = vst.msk [vmem:[%s3712_s5 + $0xc8] sm:$0xff] %vm397_vm0, %v390_v25  ;;  %v392_v27 = vld [vmem:[%s3684_s0 + $0xd8] sm:$0xff]  ;;  %v393_v28 = vld [vmem:[%s3684_s0 + $0xe0] sm:$0xff] }
  0xa3   : > { %424 = vst.msk [vmem:[%s3712_s5 + $0xd0] sm:$0xff] %vm397_vm0, %v391_v26  ;;  %v394_v29 = vld [vmem:[%s3684_s0 + $0xe8] sm:$0xff]  ;;  %425 = vst.msk [vmem:[%s3712_s5 + $0xd8] sm:$0xff] %vm397_vm0, %v392_v27  ;;  %v395_v30 = vld [vmem:[%s3684_s0 + $0xf0] sm:$0xff] }
  0xa4   : > { %426 = vst.msk [vmem:[%s3712_s5 + $0xe0] sm:$0xff] %vm397_vm0, %v393_v28  ;;  %427 = vst.msk [vmem:[%s3712_s5 + $0xe8] sm:$0xff] %vm397_vm0, %v394_v29  ;;  %v396_v31 = vld [vmem:[%s3684_s0 + $0xf8] sm:$0xff] }
  0xa5   : > { %428 = vst.msk [vmem:[%s3712_s5 + $0xf0] sm:$0xff] %vm397_vm0, %v395_v30  ;;  %429 = vst.msk [vmem:[%s3712_s5 + $0xf8] sm:$0xff] %vm397_vm0, %v396_v31 }
  0xa6 PF: > { %v430_v32 = vld [vmem:[%s3712_s5] sm:$0xff]  ;;  %v431_v33 = vld [vmem:[%s3712_s5 + $0x8] sm:$0xff]  ;;  %vm635_vm1 = vcmask 1040384   ;;  %vm636_vm2 = vsmask.f32 256  ;;  %vm750_vm3 = vcmask 1046528  }
  0xa7   : > { %v432_v34 = vld [vmem:[%s3712_s5 + $0x10] sm:$0xff]  ;;  %v462_v35 = vpack.c.bf16 %v431_v33, %v430_v32  ;;  %v433_v36 = vld [vmem:[%s3712_s5 + $0x18] sm:$0xff]  ;;  %s3369_s24 = smov 32   ;;  %vm3828_vm4 = vmand %vm635_vm1, %vm636_vm2  ;;  %v3370_v56 = vmov 0   ;;  %s3371_s14 = smov 64   ;;  %vm831_vm5 = vcmask 261120  }
  0xa8   : > { %v434_v37 = vld [vmem:[%s3712_s5 + $0x20] sm:$0xff]  ;;  %v435_v38 = vld [vmem:[%s3712_s5 + $0x28] sm:$0xff]  ;;  %v463_v39 = vpack.c.bf16 %v433_v36, %v432_v34  ;;  %2889 = vmatprep.mubr.bf16.mxu0 %v3370_v56  ;;  %2937 = vmatprep.mubr.bf16.mxu1 %v3370_v56  ;;  %vm880_vm6 = vcmask 523264   ;;  %vm949_vm7 = vcmask 785408   ;;  %s3372_s27 = smov 96   ;;  %s5125_s25 = sld [smem:[#allocation13_spill]] }
  0xa9   : > { %v464_v40 = vpack.c.bf16 %v435_v38, %v434_v37  ;;  %v436_v41 = vld [vmem:[%s3712_s5 + $0x30] sm:$0xff]  ;;  %v437_v42 = vld [vmem:[%s3712_s5 + $0x38] sm:$0xff]  ;;  %686 = vrot.lane.b32.xlu0 %v462_v35, %s3369_s24  ;;  %v492_v43 = vshrl.u32 %v462_v35, 16  ;;  %v495_v44 = vshll.u32 %v462_v35, 16  ;;  %v446_v27 = vld [vmem:[%s3712_s5 + $0x80] sm:$0xff]  ;;  %s2618_s29 = sshll.u32 %s3712_s5, 4  ;;  %s5000_s29 = int_to_ptr.vmem [resolvable:$true] %s2618_s29 }
  0xaa   : > { %v3820_v45 = vpack.c.bf16 %v437_v42, %v436_v41  ;;  %v438_v46 = vld [vmem:[%s3712_s5 + $0x40] sm:$0xff]  ;;  %v439_v47 = vld [vmem:[%s3712_s5 + $0x48] sm:$0xff]  ;;  %688 = vrot.lane.b32.xlu1 %v463_v39, %s3369_s24  ;;  %v499_v49 = vshrl.u32 %v463_v39, 16  ;;  %v502_v50 = vshll.u32 %v463_v39, 16  ;;  %s2605_s4 = scalar_lea.sflag [#allocation4], %s3680_s13  ;;  %s3234_s6 = scalar_lea.vmem %s5000_s29, 4096 }
  0xab   : > { %v440_v48 = vld [vmem:[%s3712_s5 + $0x50] sm:$0xff]  ;;  %v506_v52 = vshrl.u32 %v464_v40, 16  ;;  %v509_v53 = vshll.u32 %v464_v40, 16  ;;  %v441_v54 = vld [vmem:[%s3712_s5 + $0x58] sm:$0xff]  ;;  %v494_v57 = vrot.slane %v492_v43, 7  ;;  %v466_v60 = vpack.c.bf16 %v439_v47, %v438_v46  ;;  %v447_v28 = vld [vmem:[%s3712_s5 + $0x88] sm:$0xff]  ;;  %p3235_p0 = scmp.ne.s32.totalorder %s5000_s29, %s3234_s6 }
  0xac   : > { %v442_v55 = vld [vmem:[%s3712_s5 + $0x60] sm:$0xff]  ;;  %v513_v58 = vshrl.u32 %v3820_v45, 16  ;;  %v516_v59 = vshll.u32 %v3820_v45, 16  ;;  %v443_v61 = vld [vmem:[%s3712_s5 + $0x68] sm:$0xff]  ;;  %v501_v62 = vrot.slane %v499_v49, 7  ;;  %v3839_v0 = vpack.c.bf16 %v441_v54, %v440_v48  ;;  %p5127_p10 = scmp.ne.s32.totalorder %s5107_s10, 0 }
  0xad   : > { %v508_v63 = vrot.slane %v506_v52, 7  ;;  %v3841_v1 = vpack.c.bf16 %v443_v61, %v442_v55  ;;  %v497_v2 = vor.u32 %v495_v44, %v494_v57  ;;  %v654_v3 = vsel %vm3828_vm4, %v494_v57, 0  ;;  %v3100_v14 = vld [vmem:[%s3692_s18] sm:$0xff]   ;;  %v445_v26 = vld [vmem:[%s3712_s5 + $0x78] sm:$0xff]  ;;  %v3102_v42 = vld [vmem:[%s3692_s18 + $0x10] sm:$0xff]  }
  0xae   : > { %v520_v4 = vshrl.u32 %v466_v60, 16  ;;  %v523_v5 = vshll.u32 %v466_v60, 16  ;;  %v752_v6 = vrot.slane %v654_v3, 1  ;;  %690 = vrot.lane.b32.xlu1 %v464_v40, %s3369_s24  ;;  %v504_v7 = vor.u32 %v502_v50, %v501_v62  ;;  %v444_v22 = vld [vmem:[%s3712_s5 + $0x70] sm:$0xff]  ;;  %2877 = vmatprep.subr.bf16.mxu0 %v3100_v14  ;;  %v3101_v37 = vld [vmem:[%s3692_s18 + $0x8] sm:$0xff]   ;;  %v450_v49 = vld [vmem:[%s3712_s5 + $0xa0] sm:$0xff]  ;;  %p3236_p8 = pnand %p3235_p0, %p5127_p10 }
  0xaf   : > { %v655_v8 = vsel %vm3828_vm4, %v501_v62, 0  ;;  %v511_v9 = vor.u32 %v509_v53, %v508_v63  ;;  %v3850_v10 = vsel %vm3828_vm4, 0, %v497_v2  ;;  %v656_v12 = vsel %vm3828_vm4, %v508_v63, 0  ;;  %2878 = vmatpush3.bf16.msra.mxu0 %v3100_v14  ;;  %v451_v55 = vld [vmem:[%s3712_s5 + $0xa8] sm:$0xff]  ;;  %v448_v61 = vld [vmem:[%s3712_s5 + $0x90] sm:$0xff]  ;;  %v449_v2 = vld [vmem:[%s3712_s5 + $0x98] sm:$0xff] }
  0xb0   : > { %v755_v11 = vrot.slane %v655_v8, 1  ;;  %v515_v13 = vrot.slane %v513_v58, 7  ;;  %v751_v15 = vrot.slane %v3850_v10, 1  ;;  %v3858_v16 = vsel %vm3828_vm4, 0, %v504_v7  ;;  %2879 = vmatprep.subr.bf16.mxu0 %v3101_v37  ;;  %v3103_v57 = vld [vmem:[%s3692_s18 + $0x18] sm:$0xff]   ;;  %v3104_v7 = vld [vmem:[%s3692_s18 + $0x20] sm:$0xff]   ;;  %p3237_p4 = pneg %p3236_p8 }
  0xb1   : > { %v3862_v17 = vsel %vm3828_vm4, 0, %v511_v9  ;;  %v758_v18 = vrot.slane %v656_v12, 1  ;;  %v754_v19 = vrot.slane %v3858_v16, 1  ;;  %v522_v24 = vrot.slane %v520_v4, 7 }
  0xb2   : > { %v757_v20 = vrot.slane %v3862_v17, 1  ;;  %v518_v21 = vor.u32 %v516_v59, %v515_v13  ;;  %v753_v23 = vsel %vm750_vm3, %v751_v15, %v752_v6  ;;  %v527_v25 = vshrl.u32 %v3839_v0, 16 }
  0xb3   : > { %799 = vrot.lane.b32.xlu0 %v753_v23, %s3371_s14  ;;  %v756_v29 = vsel %vm750_vm3, %v754_v19, %v755_v11  ;;  %v657_v32 = vsel %vm3828_vm4, %v515_v13, 0  ;;  %v525_v33 = vor.u32 %v523_v5, %v522_v24  ;;  %v658_v34 = vsel %vm3828_vm4, %v522_v24, 0  ;;  %2880 = vmatpush3.bf16.msra.mxu0 %v3101_v37  ;;  %v453_v19 = vld [vmem:[%s3712_s5 + $0xb8] sm:$0xff] }
  0xb4   : > { %v759_v30 = vsel %vm750_vm3, %v757_v20, %v758_v18  ;;  %v3877_v31 = vsel %vm3828_vm4, 0, %v518_v21  ;;  %v530_v35 = vshll.u32 %v3839_v0, 16  ;;  %v534_v36 = vshrl.u32 %v3841_v1, 16  ;;  %2881 = vmatprep.subr.bf16.mxu0 %v3102_v42  ;;  %v452_v18 = vld [vmem:[%s3712_s5 + $0xb0] sm:$0xff]  ;;  %v454_v20 = vld [vmem:[%s3712_s5 + $0xc0] sm:$0xff]  ;;  %v455_v21 = vld [vmem:[%s3712_s5 + $0xc8] sm:$0xff] }
  0xb5   : > { %803 = vrot.lane.b32.xlu1 %v759_v30, %s3371_s14  ;;  %v764_v38 = vrot.slane %v658_v34, 1  ;;  %v537_v39 = vshll.u32 %v3841_v1, 16  ;;  %v529_v40 = vrot.slane %v527_v25, 7  ;;  %v3888_v41 = vpack.c.bf16 %v445_v26, %v444_v22  ;;  %v3105_v26 = vld [vmem:[%s3692_s18 + $0x28] sm:$0xff]   ;;  %s2828_s18 = sshll.u32 %s5125_s25, 12 }
  0xb6   : > { %v3893_v43 = vsel %vm3828_vm4, 0, %v525_v33  ;;  %v536_v44 = vrot.slane %v534_v36, 7  ;;  %v3895_v46 = vpack.c.bf16 %v447_v28, %v446_v27  ;;  %v761_v47 = vrot.slane %v657_v32, 1 }
  0xb7   : > { %801 = vrot.lane.b32.xlu0 %v756_v29, %s3371_s14  ;;  %v763_v48 = vrot.slane %v3893_v43, 1  ;;  %v760_v50 = vrot.slane %v3877_v31, 1  ;;  %v532_v52 = vor.u32 %v530_v35, %v529_v40  ;;  %v541_v54 = vshrl.u32 %v3888_v41, 16  ;;  %2882 = vmatpush3.bf16.msra.mxu0 %v3102_v42 }
  0xb8   : > { %v539_v53 = vor.u32 %v537_v39, %v536_v44  ;;  %v548_v59 = vshrl.u32 %v3895_v46, 16  ;;  %v551_v63 = vshll.u32 %v3895_v46, 16  ;;  %v659_v3 = vsel %vm3828_vm4, %v529_v40, 0  ;;  %2883 = vmatprep.subr.bf16.mxu0 %v3103_v57 }
  0xb9   : > { %694 = vrot.lane.b32.xlu1 %v466_v60, %s3369_s24  ;;  %v765_v58 = vsel %vm750_vm3, %v763_v48, %v764_v38  ;;  %v660_v60 = vsel %vm3828_vm4, %v536_v44, 0  ;;  %v544_v4 = vshll.u32 %v3888_v41, 16  ;;  %v3921_v6 = vpack.c.bf16 %v451_v55, %v450_v49  ;;  %v458_v44 = vld [vmem:[%s3712_s5 + $0xe0] sm:$0xff]  ;;  %v456_v55 = vld [vmem:[%s3712_s5 + $0xd0] sm:$0xff] }
  0xba   : > { %v3910_v62 = vsel %vm3828_vm4, 0, %v539_v53  ;;  %v550_v5 = vrot.slane %v548_v59, 7  ;;  %v762_v8 = vsel %vm750_vm3, %v760_v50, %v761_v47  ;;  %v543_v9 = vrot.slane %v541_v54, 7  ;;  %v459_v47 = vld [vmem:[%s3712_s5 + $0xe8] sm:$0xff] }
  0xbb   : > { %692 = vrot.lane.b32.xlu0 %v3820_v45, %s3369_s24  ;;  %v3928_v45 = vsel %vm3828_vm4, 0, %v532_v52  ;;  %v769_v11 = vrot.slane %v3910_v62, 1  ;;  %v770_v12 = vrot.slane %v660_v60, 1  ;;  %v3931_v14 = vpack.c.bf16 %v449_v2, %v448_v61  ;;  %2884 = vmatpush3.bf16.msra.mxu0 %v3103_v57  ;;  %v457_v57 = vld [vmem:[%s3712_s5 + $0xd8] sm:$0xff]  ;;  %v460_v60 = vld [vmem:[%s3712_s5 + $0xf0] sm:$0xff] }
  0xbc   : > { %v553_v13 = vor.u32 %v551_v63, %v550_v5  ;;  %v562_v15 = vshrl.u32 %v3921_v6, 16  ;;  %v766_v22 = vrot.slane %v3928_v45, 1  ;;  %v767_v23 = vrot.slane %v659_v3, 1  ;;  %2885 = vmatprep.subr.bf16.mxu0 %v3104_v7  ;;  %v461_v63 = vld [vmem:[%s3712_s5 + $0xf8] sm:$0xff] }
  0xbd   : > { %807 = vrot.lane.b32.xlu1 %v765_v58, %s3371_s14  ;;  %v546_v24 = vor.u32 %v544_v4, %v543_v9  ;;  %v662_v25 = vsel %vm3828_vm4, %v550_v5, 0  ;;  %v771_v27 = vsel %vm750_vm3, %v769_v11, %v770_v12  ;;  %v555_v29 = vshrl.u32 %v3931_v14, 16 }
  0xbe   : > { %v3948_v28 = vsel %vm3828_vm4, 0, %v553_v13  ;;  %v565_v30 = vshll.u32 %v3921_v6, 16  ;;  %v3952_v32 = vpack.c.bf16 %v455_v21, %v454_v20  ;;  %v768_v33 = vsel %vm750_vm3, %v766_v22, %v767_v23 }
  0xbf   : > { %805 = vrot.lane.b32.xlu0 %v762_v8, %s3371_s14  ;;  %2886 = vmatpush3.bf16.msra.mxu0 %v3104_v7  ;;  %v3960_v34 = vsel %vm3828_vm4, 0, %v546_v24  ;;  %v661_v35 = vsel %vm3828_vm4, %v543_v9, 0  ;;  %v3964_v36 = vpack.c.bf16 %v453_v19, %v452_v18  ;;  %v775_v37 = vrot.slane %v3948_v28, 1 }
  0xc0   : > { %2887 = vmatprep.subr.bf16.mxu0 %v3105_v26  ;;  %v776_v38 = vrot.slane %v662_v25, 1  ;;  %v557_v39 = vrot.slane %v555_v29, 7  ;;  %v576_v42 = vshrl.u32 %v3952_v32, 16  ;;  %v772_v48 = vrot.slane %v3960_v34, 1 }
  0xc1   : > { %698 = vrot.lane.b32.xlu1 %v3841_v1, %s3369_s24  ;;  %v564_v1 = vrot.slane %v562_v15, 7  ;;  %v773_v49 = vrot.slane %v661_v35, 1  ;;  %v569_v50 = vshrl.u32 %v3964_v36, 16  ;;  %v579_v59 = vshll.u32 %v3952_v32, 16 }
  0xc2   : > { %v777_v52 = vsel %vm750_vm3, %v775_v37, %v776_v38  ;;  %v476_v61 = vpack.c.bf16 %v459_v47, %v458_v44  ;;  %v572_v3 = vshll.u32 %v3964_v36, 16  ;;  %v475_v5 = vpack.c.bf16 %v457_v57, %v456_v55 }
  0xc3   : > { %696 = vrot.lane.b32.xlu0 %v3839_v0, %s3369_s24  ;;  %v558_v0 = vshll.u32 %v3931_v14, 16  ;;  %v567_v40 = vor.u32 %v565_v30, %v564_v1  ;;  %2888 = vmatpush3.bf16.msra.mxu0 %v3105_v26  ;;  %v664_v54 = vsel %vm3828_vm4, %v564_v1, 0  ;;  %v774_v2 = vsel %vm750_vm3, %v772_v48, %v773_v49 }
  0xc4   : > { %v571_v4 = vrot.slane %v569_v50, 7  ;;  %v663_v8 = vsel %vm3828_vm4, %v557_v39, 0  ;;  %v590_v12 = vshrl.u32 %v476_v61, 16  ;;  %v477_v13 = vpack.c.bf16 %v461_v63, %v460_v60 }
  0xc5   : > { %811 = vrot.lane.b32.xlu1 %v771_v27, %s3371_s14  ;;  %v560_v53 = vor.u32 %v558_v0, %v557_v39  ;;  %v3983_v58 = vsel %vm3828_vm4, 0, %v567_v40  ;;  %v779_v18 = vrot.slane %v663_v8, 1  ;;  %v583_v22 = vshrl.u32 %v475_v5, 16 }
  0xc6   : > { %v781_v9 = vrot.slane %v3983_v58, 1  ;;  %v574_v19 = vor.u32 %v572_v3, %v571_v4  ;;  %v593_v24 = vshll.u32 %v476_v61, 16  ;;  %v592_v25 = vrot.slane %v590_v12, 7 }
  0xc7   : > { %809 = vrot.lane.b32.xlu0 %v768_v33, %s3371_s14  ;;  %v3995_v7 = vsel %vm3828_vm4, 0, %v560_v53  ;;  %v597_v26 = vshrl.u32 %v477_v13, 16  ;;  %v665_v29 = vsel %vm3828_vm4, %v571_v4, 0  ;;  %v586_v33 = vshll.u32 %v475_v5, 16 }
  0xc8   : > { %v778_v15 = vrot.slane %v3995_v7, 1  ;;  %v4017_v27 = vsel %vm3828_vm4, 0, %v574_v19  ;;  %v585_v35 = vrot.slane %v583_v22, 7  ;;  %v595_v37 = vor.u32 %v593_v24, %v592_v25 }
  0xc9   : > { %702 = vrot.lane.b32.xlu1 %v3895_v46, %s3369_s24  ;;  %v578_v46 = vrot.slane %v576_v42, 7  ;;  %v600_v38 = vshll.u32 %v477_v13, 16  ;;  %v599_v0 = vrot.slane %v597_v26, 7  ;;  %v785_v39 = vrot.slane %v665_v29, 1 }
  0xca   : > { %v588_v42 = vor.u32 %v586_v33, %v585_v35  ;;  %v4029_v44 = vsel %vm3828_vm4, 0, %v595_v37  ;;  %v668_v47 = vsel %vm3828_vm4, %v592_v25, 0  ;;  %v667_v50 = vsel %vm3828_vm4, %v585_v35, 0 }
  0xcb   : > { %700 = vrot.lane.b32.xlu0 %v3888_v41, %s3369_s24  ;;  %v782_v41 = vrot.slane %v664_v54, 1  ;;  %v581_v11 = vor.u32 %v579_v59, %v578_v46  ;;  %v666_v21 = vsel %vm3828_vm4, %v578_v46, 0  ;;  %v602_v48 = vor.u32 %v600_v38, %v599_v0 }
  0xcc   : > { %v788_v1 = vrot.slane %v666_v21, 1  ;;  %v794_v53 = vrot.slane %v668_v47, 1  ;;  %v791_v57 = vrot.slane %v667_v50, 1 }
  0xcd   : > { %815 = vrot.lane.b32.xlu1 %v777_v52, %s3371_s14  ;;  %v783_v20 = vsel %vm750_vm3, %v781_v9, %v782_v41  ;;  %v4009_v23 = vsel %vm3828_vm4, 0, %v581_v11  ;;  %v793_v52 = vrot.slane %v4029_v44, 1  ;;  %v4046_v54 = vsel %vm3828_vm4, 0, %v602_v48 }
  0xce   : > { %v787_v30 = vrot.slane %v4009_v23, 1  ;;  %v796_v46 = vrot.slane %v4046_v54, 1 }
  0xcf   : > { %813 = vrot.lane.b32.xlu0 %v774_v2, %s3371_s14  ;;  %v795_v59 = vsel %vm750_vm3, %v793_v52, %v794_v53 }
  0xd0   : > { %v789_v40 = vsel %vm750_vm3, %v787_v30, %v788_v1 }
  0xd1   : > { %706 = vrot.lane.b32.xlu1 %v3921_v6, %s3369_s24  ;;  %v780_v6 = vsel %vm750_vm3, %v778_v15, %v779_v18 }
  0xd3   : > { %704 = vrot.lane.b32.xlu0 %v3931_v14, %s3369_s24  ;;  %v784_v14 = vrot.slane %v4017_v27, 1 }
  0xd5   : > { %819 = vrot.lane.b32.xlu1 %v783_v20, %s3371_s14  ;;  %v786_v49 = vsel %vm750_vm3, %v784_v14, %v785_v39 }
  0xd7   : > { %817 = vrot.lane.b32.xlu0 %v780_v6, %s3371_s14 }
  0xd9   : > { %710 = vrot.lane.b32.xlu1 %v3952_v32, %s3369_s24  ;;  %v4039_v32 = vsel %vm3828_vm4, 0, %v588_v42 }
  0xda   : > { %v790_v55 = vrot.slane %v4039_v32, 1 }
  0xdb   : > { %708 = vrot.lane.b32.xlu0 %v3964_v36, %s3369_s24  ;;  %v669_v36 = vsel %vm3828_vm4, %v599_v0, 0 }
  0xdc   : > { %v797_v60 = vrot.slane %v669_v36, 1  ;;  %v792_v63 = vsel %vm750_vm3, %v790_v55, %v791_v57 }
  0xdd   : > { %823 = vrot.lane.b32.xlu1 %v789_v40, %s3371_s14 }
  0xde   : > { %v798_v2 = vsel %vm750_vm3, %v796_v46, %v797_v60 }
  0xdf   : > { %821 = vrot.lane.b32.xlu0 %v786_v49, %s3371_s14 }
  0xe1   : > { %714 = vrot.lane.b32.xlu1 %v476_v61, %s3369_s24 }
  0xe3   : > { %712 = vrot.lane.b32.xlu0 %v475_v5, %s3369_s24 }
  0xe5   : > { %827 = vrot.lane.b32.xlu1 %v795_v59, %s3371_s14 }
  0xe7   : > { %825 = vrot.lane.b32.xlu0 %v792_v63, %s3371_s14 }
  0xe9   : > { %829 = vrot.lane.b32.xlu1 %v798_v2, %s3371_s14 }
  0xeb   : > { %716 = vrot.lane.b32.xlu0 %v477_v13, %s3369_s24 }
 0x11b   : > { %v687_v3 = vpop.permute.xlu0 %686 }
 0x11c   : > { %v689_v61 = vpop.permute.xlu1 %688  ;;  %v834_v5 = vsel %vm831_vm5, %v3850_v10, %v687_v3 }
 0x11d   : > { %v837_v11 = vsel %vm831_vm5, %v3858_v16, %v689_v61 }
 0x120   : > { %v691_v4 = vpop.permute.xlu1 %690 }
 0x121   : > { %v840_v18 = vsel %vm831_vm5, %v3862_v17, %v691_v4 }
 0x125   : > { %v800_v8 = vpop.permute.xlu0 %799 }
 0x126   : > { %v882_v9 = vsel %vm880_vm6, %v834_v5, %v800_v8 }
 0x127   : > { %v804_v41 = vpop.permute.xlu1 %803  ;;  %2890 = vmatmul.mubr.msk.bf16.vlgmr.msra.gmra.mrb[0].mxu0 %vm949_vm7, %v882_v9 }
 0x128   : > { %v886_v10 = vsel %vm880_vm6, %v840_v18, %v804_v41 }
 0x129   : > { %v802_v12 = vpop.permute.xlu0 %801 }
 0x12a   : > { %v884_v13 = vsel %vm880_vm6, %v837_v11, %v802_v12 }
 0x12b   : > { %v695_v15 = vpop.permute.xlu1 %694  ;;  %2893 = vmatprep.mubr.msk.bf16.mxu0 %vm949_vm7, %v884_v13 }
 0x12c   : > { %v846_v16 = vsel %vm831_vm5, %v3893_v43, %v695_v15 }
 0x12d   : > { %v693_v19 = vpop.permute.xlu0 %692 }
 0x12e   : > { %v843_v21 = vsel %vm831_vm5, %v3877_v31, %v693_v19 }
 0x12f   : > { %v808_v20 = vpop.permute.xlu1 %807  ;;  %2894 = vmatmul.mubr.msk.bf16.gmra.mrb[4].mxu0 %vm949_vm7, %v886_v10 }
 0x130   : > { %v890_v17 = vsel %vm880_vm6, %v846_v16, %v808_v20 }
 0x131   : > { %v806_v22 = vpop.permute.xlu0 %805 }
 0x132   : > { %v888_v24 = vsel %vm880_vm6, %v843_v21, %v806_v22 }
 0x133   : > { %v699_v25 = vpop.permute.xlu1 %698  ;;  %2897 = vmatprep.mubr.msk.bf16.mxu0 %vm949_vm7, %v888_v24 }
 0x134   : > { %v852_v31 = vsel %vm831_vm5, %v3910_v62, %v699_v25 }
 0x135   : > { %v697_v26 = vpop.permute.xlu0 %696 }
 0x136   : > { %v849_v29 = vsel %vm831_vm5, %v3928_v45, %v697_v26 }
 0x137   : > { %v812_v6 = vpop.permute.xlu1 %811  ;;  %2898 = vmatmul.mubr.msk.bf16.gmra.mrb[8].mxu0 %vm949_vm7, %v890_v17 }
 0x138   : > { %v894_v33 = vsel %vm880_vm6, %v852_v31, %v812_v6 }
 0x139   : > { %v810_v30 = vpop.permute.xlu0 %809 }
 0x13a   : > { %v892_v43 = vsel %vm880_vm6, %v849_v29, %v810_v30 }
 0x13b   : > { %v703_v1 = vpop.permute.xlu1 %702  ;;  %2901 = vmatprep.mubr.msk.bf16.mxu0 %vm949_vm7, %v892_v43 }
 0x13c   : > { %v858_v45 = vsel %vm831_vm5, %v3948_v28, %v703_v1 }
 0x13d   : > { %v701_v35 = vpop.permute.xlu0 %700 }
 0x13e   : > { %v855_v38 = vsel %vm831_vm5, %v3960_v34, %v701_v35 }
 0x13f   : > { %v816_v37 = vpop.permute.xlu1 %815  ;;  %2902 = vmatmul.mubr.msk.bf16.gmra.mrb[12].mxu0 %vm949_vm7, %v894_v33 }
 0x140   : > { %v898_v39 = vsel %vm880_vm6, %v858_v45, %v816_v37 }
 0x141   : > { %v814_v0 = vpop.permute.xlu0 %813 }
 0x142   : > { %v896_v62 = vsel %vm880_vm6, %v855_v38, %v814_v0 }
 0x143   : > { %v707_v14 = vpop.permute.xlu1 %706  ;;  %2905 = vmatprep.mubr.msk.bf16.mxu0 %vm949_vm7, %v896_v62 }
 0x144   : > { %v864_v34 = vsel %vm831_vm5, %v3983_v58, %v707_v14 }
 0x145   : > { %v705_v40 = vpop.permute.xlu0 %704 }
 0x146   : > { %v861_v47 = vsel %vm831_vm5, %v3995_v7, %v705_v40 }
 0x147   : > { %v820_v42 = vpop.permute.xlu1 %819  ;;  %2906 = vmatmul.mubr.msk.bf16.gmra.mrb[16].mxu0 %vm949_vm7, %v898_v39 }
 0x148   : > { %v902_v50 = vsel %vm880_vm6, %v864_v34, %v820_v42  ;;  %v3106_v42 = vld [vmem:[%s3710_s1] sm:$0xff]   ;;  %v3107_v34 = vld [vmem:[%s3710_s1 + $0x8] sm:$0xff]  }
 0x149   : > { %v818_v48 = vpop.permute.xlu0 %817  ;;  %2925 = vmatprep.subr.bf16.mxu1 %v3106_v42 }
 0x14a   : > { %v900_v28 = vsel %vm880_vm6, %v861_v47, %v818_v48  ;;  %2926 = vmatpush3.bf16.msra.mxu1 %v3106_v42 }
 0x14b   : > { %v711_v49 = vpop.permute.xlu1 %710  ;;  %2909 = vmatprep.mubr.msk.bf16.mxu0 %vm949_vm7, %v900_v28  ;;  %2927 = vmatprep.subr.bf16.mxu1 %v3107_v34 }
 0x14c   : > { %v870_v7 = vsel %vm831_vm5, %v4009_v23, %v711_v49  ;;  %v3108_v49 = vld [vmem:[%s3710_s1 + $0x10] sm:$0xff]  }
 0x14d   : > { %v709_v52 = vpop.permute.xlu0 %708 }
 0x14e   : > { %v867_v36 = vsel %vm831_vm5, %v4017_v27, %v709_v52  ;;  %2928 = vmatpush3.bf16.msra.mxu1 %v3107_v34 }
 0x14f   : > { %v824_v53 = vpop.permute.xlu1 %823  ;;  %2910 = vmatmul.mubr.msk.bf16.gmra.mrb[20].mxu0 %vm949_vm7, %v902_v50  ;;  %2929 = vmatprep.subr.bf16.mxu1 %v3108_v49 }
 0x150   : > { %v906_v59 = vsel %vm880_vm6, %v870_v7, %v824_v53  ;;  %v3109_v53 = vld [vmem:[%s3710_s1 + $0x18] sm:$0xff]  }
 0x151   : > { %v822_v55 = vpop.permute.xlu0 %821 }
 0x152   : > { %v904_v58 = vsel %vm880_vm6, %v867_v36, %v822_v55  ;;  %2930 = vmatpush3.bf16.msra.mxu1 %v3108_v49  ;;  %v3110_v55 = vld [vmem:[%s3710_s1 + $0x20] sm:$0xff]  }
 0x153   : > { %v715_v57 = vpop.permute.xlu1 %714  ;;  %2913 = vmatprep.mubr.msk.bf16.mxu0 %vm949_vm7, %v904_v58  ;;  %2931 = vmatprep.subr.bf16.mxu1 %v3109_v53  ;;  %v4324_v58 = vld [vmem:[%s356_s15] ss:$0 sm:$0xff]  ;;  %s5126_s15 = sld [smem:[#allocation22_spill]] }
 0x154   : > { %v876_v27 = vsel %vm831_vm5, %v4029_v44, %v715_v57 }
 0x155   : > { %v713_v46 = vpop.permute.xlu0 %712 }
 0x156   : > { %v873_v60 = vsel %vm831_vm5, %v4039_v32, %v713_v46  ;;  %2932 = vmatpush3.bf16.msra.mxu1 %v3109_v53 }
 0x157   : > { %2914 = vmatmul.mubr.msk.bf16.gmra.mrb[24].mxu0 %vm949_vm7, %v906_v59  ;;  %v828_v63 = vpop.permute.xlu1 %827  ;;  %2933 = vmatprep.subr.bf16.mxu1 %v3110_v55 }
 0x158   : > { %v910_v61 = vsel %vm880_vm6, %v876_v27, %v828_v63 }
 0x159   : > { %v826_v2 = vpop.permute.xlu0 %825  ;;  %s4998_s11 = scalar_lea.hbm %s5126_s15, %s2828_s18 }
 0x15a   : > { %v908_v23 = vsel %vm880_vm6, %v873_v60, %v826_v2  ;;  %2934 = vmatpush3.bf16.msra.mxu1 %v3110_v55 }
 0x15b   : > { %2917 = vmatprep.mubr.msk.bf16.mxu0 %vm949_vm7, %v908_v23  ;;  %v830_v3 = vpop.permute.xlu1 %829  ;;  %v3111_v23 = vld [vmem:[%s3710_s1 + $0x28] sm:$0xff]  }
 0x15c   : > { %2935 = vmatprep.subr.bf16.mxu1 %v3111_v23 }
 0x15d   : > { %v717_v4 = vpop.permute.xlu0 %716 }
 0x15e   : > { %v879_v5 = vsel %vm831_vm5, %v4046_v54, %v717_v4  ;;  %2936 = vmatpush3.bf16.msra.mxu1 %v3111_v23 }
 0x15f   : > { %2918 = vmatmul.mubr.msk.bf16.gmra.mrb[28].mxu0 %vm949_vm7, %v910_v61  ;;  %v912_v32 = vsel %vm880_vm6, %v879_v5, %v830_v3 }
 0x160   : > { %2921 = vmatprep.mubr.msk.bf16.mxu0 %vm949_vm7, %v912_v32 }
 0x167   : > { %2922 = vmatmul.mubr.bf16.gmra.mrb[32].mxu0 %v3370_v56 }
 0x1fa   : > { %v4127_v44 = vpop.f32.mrb[0].mxu0 }
 0x1fb   : > { %1194 = vrot.lane.b32.xlu0 %v4127_v44, %s3372_s27  ;;  %v4131_v8 = vpop.f32.mrb[1].mxu0 }
 0x1fc   : > { %v4133_v9 = vpop.f32.mrb[2].mxu0 }
 0x1fd   : > { %1196 = vrot.lane.b32.xlu1 %v4133_v9, %s3372_s27  ;;  %v4137_v54 = vpop.f32.mrb[3].mxu0 }
 0x202   : > { %v4139_v41 = vpop.f32.mrb[4].mxu0 }
 0x203   : > { %1202 = vrot.lane.b32.xlu0 %v4139_v41, %s3372_s27  ;;  %v4143_v11 = vpop.f32.mrb[5].mxu0 }
 0x204   : > { %v4145_v12 = vpop.f32.mrb[6].mxu0 }
 0x205   : > { %1204 = vrot.lane.b32.xlu1 %v4145_v12, %s3372_s27  ;;  %v4149_v13 = vpop.f32.mrb[7].mxu0 }
 0x207   : > { %1328 = vrot.lane.b32.xlu0 %v4139_v41, %s3371_s14 }
 0x209   : > { %1330 = vrot.lane.b32.xlu1 %v4145_v12, %s3371_s14 }
 0x20a   : > { %v4155_v15 = vpop.f32.mrb[8].mxu0 }
 0x20b   : > { %1324 = vrot.lane.b32.xlu0 %v4143_v11, %s3371_s14  ;;  %v4159_v18 = vpop.f32.mrb[9].mxu0 }
 0x20c   : > { %v4161_v19 = vpop.f32.mrb[10].mxu0 }
 0x20d   : > { %1326 = vrot.lane.b32.xlu1 %v4149_v13, %s3371_s14  ;;  %v4165_v10 = vpop.f32.mrb[11].mxu0 }
 0x20f   : > { %1198 = vrot.lane.b32.xlu0 %v4143_v11, %s3372_s27 }
 0x211   : > { %1200 = vrot.lane.b32.xlu1 %v4149_v13, %s3372_s27 }
 0x212   : > { %v4171_v20 = vpop.f32.mrb[12].mxu0 }
 0x213   : > { %1210 = vrot.lane.b32.xlu0 %v4155_v15, %s3372_s27  ;;  %v4175_v21 = vpop.f32.mrb[13].mxu0 }
 0x214   : > { %v4177_v16 = vpop.f32.mrb[14].mxu0 }
 0x215   : > { %1212 = vrot.lane.b32.xlu1 %v4161_v19, %s3372_s27  ;;  %v4181_v22 = vpop.f32.mrb[15].mxu0 }
 0x217   : > { %1336 = vrot.lane.b32.xlu0 %v4155_v15, %s3371_s14 }
 0x219   : > { %1338 = vrot.lane.b32.xlu1 %v4161_v19, %s3371_s14 }
 0x21a   : > { %v4187_v24 = vpop.f32.mrb[16].mxu0 }
 0x21b   : > { %1332 = vrot.lane.b32.xlu0 %v4159_v18, %s3371_s14  ;;  %v4191_v25 = vpop.f32.mrb[17].mxu0 }
 0x21c   : > { %v4193_v17 = vpop.f32.mrb[18].mxu0 }
 0x21d   : > { %1334 = vrot.lane.b32.xlu1 %v4165_v10, %s3371_s14  ;;  %v4197_v26 = vpop.f32.mrb[19].mxu0 }
 0x21f   : > { %1206 = vrot.lane.b32.xlu0 %v4159_v18, %s3372_s27 }
 0x221   : > { %1208 = vrot.lane.b32.xlu1 %v4165_v10, %s3372_s27 }
 0x222   : > { %v4203_v6 = vpop.f32.mrb[20].mxu0 }
 0x223   : > { %1218 = vrot.lane.b32.xlu0 %v4171_v20, %s3372_s27  ;;  %v4207_v29 = vpop.f32.mrb[21].mxu0 }
 0x224   : > { %v4209_v31 = vpop.f32.mrb[22].mxu0 }
 0x225   : > { %1220 = vrot.lane.b32.xlu1 %v4177_v16, %s3372_s27  ;;  %v4213_v30 = vpop.f32.mrb[23].mxu0 }
 0x227   : > { %1344 = vrot.lane.b32.xlu0 %v4171_v20, %s3371_s14 }
 0x229   : > { %1346 = vrot.lane.b32.xlu1 %v4177_v16, %s3371_s14 }
 0x22a   : > { %v4219_v43 = vpop.f32.mrb[24].mxu0 }
 0x22b   : > { %1340 = vrot.lane.b32.xlu0 %v4175_v21, %s3371_s14  ;;  %v4223_v1 = vpop.f32.mrb[25].mxu0 }
 0x22c   : > { %v4225_v33 = vpop.f32.mrb[26].mxu0 }
 0x22d   : > { %1342 = vrot.lane.b32.xlu1 %v4181_v22, %s3371_s14  ;;  %v4229_v35 = vpop.f32.mrb[27].mxu0 }
 0x22f   : > { %1214 = vrot.lane.b32.xlu0 %v4175_v21, %s3372_s27 }
 0x231   : > { %1216 = vrot.lane.b32.xlu1 %v4181_v22, %s3372_s27 }
 0x232   : > { %v4235_v37 = vpop.f32.mrb[28].mxu0 }
 0x233   : > { %1226 = vrot.lane.b32.xlu0 %v4187_v24, %s3372_s27  ;;  %v4239_v38 = vpop.f32.mrb[29].mxu0 }
 0x234   : > { %v4241_v45 = vpop.f32.mrb[30].mxu0 }
 0x235   : > { %1228 = vrot.lane.b32.xlu1 %v4193_v17, %s3372_s27  ;;  %v4245_v0 = vpop.f32.mrb[31].mxu0 }
 0x237   : > { %1352 = vrot.lane.b32.xlu0 %v4187_v24, %s3371_s14 }
 0x239   : > { %1354 = vrot.lane.b32.xlu1 %v4193_v17, %s3371_s14 }
 0x23a   : > { %v2923_v62 = vpop.f32.mrb[32].mxu0 }
 0x23b   : > { %1348 = vrot.lane.b32.xlu0 %v4191_v25, %s3371_s14  ;;  %v1147_v14 = vpop.f32.mrb[33].mxu0 }
 0x23c   : > { %v2924_v39 = vpop.f32.mrb[34].mxu0 }
 0x23d   : > { %1350 = vrot.lane.b32.xlu1 %v4197_v26, %s3371_s14  ;;  %v1150_v40 = vpop.f32.mrb[35].mxu0 }
 0x23f   : > { %1222 = vrot.lane.b32.xlu0 %v4191_v25, %s3372_s27 }
 0x241   : > { %1224 = vrot.lane.b32.xlu1 %v4197_v26, %s3372_s27 }
 0x243   : > { %1234 = vrot.lane.b32.xlu0 %v4203_v6, %s3372_s27 }
 0x245   : > { %1236 = vrot.lane.b32.xlu1 %v4209_v31, %s3372_s27 }
 0x247   : > { %1360 = vrot.lane.b32.xlu0 %v4203_v6, %s3371_s14 }
 0x249   : > { %1362 = vrot.lane.b32.xlu1 %v4209_v31, %s3371_s14 }
 0x24b   : > { %1356 = vrot.lane.b32.xlu0 %v4207_v29, %s3371_s14 }
 0x24d   : > { %1358 = vrot.lane.b32.xlu1 %v4213_v30, %s3371_s14 }
 0x24f   : > { %1230 = vrot.lane.b32.xlu0 %v4207_v29, %s3372_s27 }
 0x251   : > { %1232 = vrot.lane.b32.xlu1 %v4213_v30, %s3372_s27 }
 0x253   : > { %1242 = vrot.lane.b32.xlu0 %v4219_v43, %s3372_s27 }
 0x255   : > { %1244 = vrot.lane.b32.xlu1 %v4225_v33, %s3372_s27 }
 0x257   : > { %1368 = vrot.lane.b32.xlu0 %v4219_v43, %s3371_s14 }
 0x259   : > { %1370 = vrot.lane.b32.xlu1 %v4225_v33, %s3371_s14 }
 0x25b   : > { %1364 = vrot.lane.b32.xlu0 %v4223_v1, %s3371_s14 }
 0x25d   : > { %1366 = vrot.lane.b32.xlu1 %v4229_v35, %s3371_s14 }
 0x25f   : > { %1238 = vrot.lane.b32.xlu0 %v4223_v1, %s3372_s27 }
 0x261   : > { %1240 = vrot.lane.b32.xlu1 %v4229_v35, %s3372_s27 }
 0x263   : > { %1250 = vrot.lane.b32.xlu0 %v4235_v37, %s3372_s27 }
 0x265   : > { %1252 = vrot.lane.b32.xlu1 %v4241_v45, %s3372_s27 }
 0x267   : > { %1376 = vrot.lane.b32.xlu0 %v4235_v37, %s3371_s14 }
 0x269   : > { %1378 = vrot.lane.b32.xlu1 %v4241_v45, %s3371_s14 }
 0x26b   : > { %1372 = vrot.lane.b32.xlu0 %v4239_v38, %s3371_s14 }
 0x26d   : > { %1374 = vrot.lane.b32.xlu1 %v4245_v0, %s3371_s14  ;;  %v1195_v47 = vpop.permute.xlu0 %1194 }
 0x26e   : > { %v1290_v7 = vadd.f32 %v1195_v47, %v4131_v8 }
 0x26f   : > { %1246 = vrot.lane.b32.xlu0 %v4239_v38, %s3372_s27  ;;  %v1197_v48 = vpop.permute.xlu1 %1196 }
 0x270   : > { %v1291_v59 = vadd.f32 %v1197_v48, %v4137_v54 }
 0x271   : > { %1248 = vrot.lane.b32.xlu1 %v4245_v0, %s3372_s27 }
 0x273   : > { %1380 = vrot.lane.b32.xlu0 %v1147_v14, %s3371_s14 }
 0x275   : > { %1382 = vrot.lane.b32.xlu1 %v1150_v40, %s3371_s14  ;;  %v1203_v28 = vpop.permute.xlu0 %1202 }
 0x277   : > { %v1205_v50 = vpop.permute.xlu1 %1204  ;;  %1254 = vrot.lane.b32.xlu0 %v1147_v14, %s3372_s27 }
 0x279   : > { %1256 = vrot.lane.b32.xlu1 %v1150_v40, %s3372_s27  ;;  %v1329_v52 = vpop.permute.xlu0 %1328 }
 0x27b   : > { %v1331_v36 = vpop.permute.xlu1 %1330  ;;  %1384 = vrot.lane.b32.xlu0 %v2923_v62, %s3371_s14 }
 0x27d   : > { %1386 = vrot.lane.b32.xlu1 %v2924_v39, %s3371_s14  ;;  %v1325_v57 = vpop.permute.xlu0 %1324 }
 0x27e   : > { %v1420_v46 = vadd.f32 %v1325_v57, %v1290_v7  ;;  %v1294_v7 = vadd.f32 %v1203_v28, %v4143_v11 }
 0x27f   : > { %v1327_v60 = vpop.permute.xlu1 %1326 }
 0x280   : > { %v1458_v63 = vadd.f32 %v4324_v58, %v1420_v46  ;;  %v1421_v27 = vadd.f32 %v1327_v60, %v1291_v59  ;;  %v1295_v46 = vadd.f32 %v1205_v50, %v4149_v13 }
 0x281   : > { %v1199_v2 = vpop.permute.xlu0 %1198 }
 0x282   : > { %v1459_v61 = vadd.f32 %v4324_v58, %v1421_v27  ;;  %v1292_v3 = vadd.f32 %v4127_v44, %v1199_v2  ;;  %v1490_v5 = vmax.f32 %v1458_v63, 0.0 }
 0x283   : > { %v1201_v4 = vpop.permute.xlu1 %1200 }
 0x284   : > { %v1491_v32 = vmax.f32 %v1459_v61, 0.0  ;;  %v1422_v8 = vadd.f32 %v1329_v52, %v1292_v3  ;;  %v1293_v54 = vadd.f32 %v4133_v9, %v1201_v4 }
 0x285   : > { %v4332_v62 = vpop.permute.xlu0 %1210 }
 0x286   : > { %v1460_v14 = vadd.f32 %v4324_v58, %v1422_v8  ;;  %v1423_v39 = vadd.f32 %v1331_v36, %v1293_v54  ;;  %v1522_v40 = vpack.c.bf16 %v1491_v32, %v1490_v5 }
 0x287   : > { %v4335_v42 = vpop.permute.xlu1 %1212 }
 0x288   : > { %v1461_v47 = vadd.f32 %v4324_v58, %v1423_v39  ;;  %1743 = vrot.lane.b32.xlu0 %v1522_v40, %s3369_s24  ;;  %v1552_v44 = vshrl.u32 %v1522_v40, 16  ;;  %v1492_v48 = vmax.f32 %v1460_v14, 0.0  ;;  %v1555_v52 = vshll.u32 %v1522_v40, 16 }
 0x289   : > { %v1337_v34 = vpop.permute.xlu0 %1336 }
 0x28a   : > { %v1493_v49 = vmax.f32 %v1461_v47, 0.0  ;;  %v1554_v53 = vrot.slane %v1552_v44, 7 }
 0x28b   : > { %v1339_v9 = vpop.permute.xlu1 %1338 }
 0x28c   : > { %v1523_v55 = vpack.c.bf16 %v1493_v49, %v1492_v48  ;;  %v1557_v57 = vor.u32 %v1555_v52, %v1554_v53  ;;  %v1711_v36 = vsel %vm3828_vm4, %v1554_v53, 0 }
 0x28d   : > { %v1333_v59 = vpop.permute.xlu0 %1332  ;;  %v1808_v11 = vrot.slane %v1711_v36, 1 }
 0x28e   : > { %v1424_v60 = vadd.f32 %v1333_v59, %v1294_v7  ;;  %1745 = vrot.lane.b32.xlu0 %v1523_v55, %s3369_s24  ;;  %v4346_v63 = vsel %vm3828_vm4, 0, %v1557_v57  ;;  %v1559_v27 = vshrl.u32 %v1523_v55, 16  ;;  %v1562_v61 = vshll.u32 %v1523_v55, 16 }
 0x28f   : > { %v1335_v2 = vpop.permute.xlu1 %1334  ;;  %v1807_v23 = vrot.slane %v4346_v63, 1 }
 0x290   : > { %v1462_v28 = vadd.f32 %v4324_v58, %v1424_v60  ;;  %v1425_v3 = vadd.f32 %v1335_v2, %v1295_v46  ;;  %v1561_v4 = vrot.slane %v1559_v27, 7 }
 0x291   : > { %v1207_v5 = vpop.permute.xlu0 %1206  ;;  %v1809_v13 = vsel %vm750_vm3, %v1807_v23, %v1808_v11 }
 0x292   : > { %v1463_v50 = vadd.f32 %v4324_v58, %v1425_v3  ;;  %v1296_v32 = vadd.f32 %v4139_v41, %v1207_v5  ;;  %1855 = vrot.lane.b32.xlu1 %v1809_v13, %s3371_s14  ;;  %v1564_v8 = vor.u32 %v1562_v61, %v1561_v4  ;;  %v1494_v54 = vmax.f32 %v1462_v28, 0.0 }
 0x293   : > { %v1209_v14 = vpop.permute.xlu1 %1208  ;;  %v1712_v39 = vsel %vm3828_vm4, %v1561_v4, 0  ;;  %v1299_v4 = vadd.f32 %v4335_v42, %v4165_v10 }
 0x294   : > { %v1495_v40 = vmax.f32 %v1463_v50, 0.0  ;;  %v1426_v47 = vadd.f32 %v1337_v34, %v1296_v32  ;;  %v1297_v44 = vadd.f32 %v4145_v12, %v1209_v14  ;;  %v4359_v48 = vsel %vm3828_vm4, 0, %v1564_v8 }
 0x295   : > { %v4361_v49 = vpop.permute.xlu0 %1218  ;;  %v1810_v41 = vrot.slane %v4359_v48, 1  ;;  %v1811_v52 = vrot.slane %v1712_v39, 1 }
 0x296   : > { %v1524_v53 = vpack.c.bf16 %v1495_v40, %v1494_v54  ;;  %v1464_v7 = vadd.f32 %v4324_v58, %v1426_v47  ;;  %v1427_v55 = vadd.f32 %v1339_v9, %v1297_v44  ;;  %v1298_v9 = vadd.f32 %v4332_v62, %v4159_v18 }
 0x297   : > { %v4365_v57 = vpop.permute.xlu1 %1220  ;;  %v1812_v36 = vsel %vm750_vm3, %v1810_v41, %v1811_v52 }
 0x298   : > { %v1465_v34 = vadd.f32 %v4324_v58, %v1427_v55  ;;  %1857 = vrot.lane.b32.xlu0 %v1812_v36, %s3371_s14  ;;  %1747 = vrot.lane.b32.xlu1 %v1524_v53, %s3369_s24  ;;  %v1566_v59 = vshrl.u32 %v1524_v53, 16  ;;  %v1496_v46 = vmax.f32 %v1464_v7, 0.0  ;;  %v1569_v27 = vshll.u32 %v1524_v53, 16 }
 0x299   : > { %v1345_v12 = vpop.permute.xlu0 %1344 }
 0x29a   : > { %v1497_v60 = vmax.f32 %v1465_v34, 0.0  ;;  %v1568_v23 = vrot.slane %v1566_v59, 7 }
 0x29b   : > { %v1347_v2 = vpop.permute.xlu1 %1346 }
 0x29c   : > { %v1525_v11 = vpack.c.bf16 %v1497_v60, %v1496_v46  ;;  %v1571_v61 = vor.u32 %v1569_v27, %v1568_v23  ;;  %v1713_v3 = vsel %vm3828_vm4, %v1568_v23, 0 }
 0x29d   : > { %v1341_v28 = vpop.permute.xlu0 %1340  ;;  %v1814_v8 = vrot.slane %v1713_v3, 1 }
 0x29e   : > { %v1428_v5 = vadd.f32 %v1341_v28, %v1298_v9  ;;  %1749 = vrot.lane.b32.xlu0 %v1525_v11, %s3369_s24  ;;  %v1573_v13 = vshrl.u32 %v1525_v11, 16  ;;  %v4380_v32 = vsel %vm3828_vm4, 0, %v1571_v61  ;;  %v1576_v39 = vshll.u32 %v1525_v11, 16 }
 0x29f   : > { %v1343_v50 = vpop.permute.xlu1 %1342  ;;  %v1813_v54 = vrot.slane %v4380_v32, 1 }
 0x2a0   : > { %v1466_v18 = vadd.f32 %v4324_v58, %v1428_v5  ;;  %v1429_v62 = vadd.f32 %v1343_v50, %v1299_v4  ;;  %v1575_v14 = vrot.slane %v1573_v13, 7  ;;  %v1302_v13 = vadd.f32 %v4361_v49, %v4175_v21 }
 0x2a1   : > { %v1215_v40 = vpop.permute.xlu0 %1214  ;;  %v1815_v47 = vsel %vm750_vm3, %v1813_v54, %v1814_v8  ;;  %v1303_v54 = vadd.f32 %v4365_v57, %v4181_v22 }
 0x2a2   : > { %v1467_v10 = vadd.f32 %v4324_v58, %v1429_v62  ;;  %v1300_v42 = vadd.f32 %v4155_v15, %v1215_v40  ;;  %v1498_v44 = vmax.f32 %v1466_v18, 0.0  ;;  %1859 = vrot.lane.b32.xlu1 %v1815_v47, %s3371_s14  ;;  %v1578_v52 = vor.u32 %v1576_v39, %v1575_v14 }
 0x2a3   : > { %v1217_v41 = vpop.permute.xlu1 %1216  ;;  %v1714_v36 = vsel %vm3828_vm4, %v1575_v14, 0 }
 0x2a4   : > { %v1499_v53 = vmax.f32 %v1467_v10, 0.0  ;;  %v1430_v7 = vadd.f32 %v1345_v12, %v1300_v42  ;;  %v1301_v55 = vadd.f32 %v4161_v19, %v1217_v41  ;;  %v4395_v59 = vsel %vm3828_vm4, 0, %v1578_v52 }
 0x2a5   : > { %v4391_v34 = vpop.permute.xlu0 %1226  ;;  %v1816_v23 = vrot.slane %v4395_v59, 1  ;;  %v1817_v12 = vrot.slane %v1714_v36, 1 }
 0x2a6   : > { %v1526_v15 = vpack.c.bf16 %v1499_v53, %v1498_v44  ;;  %v1468_v46 = vadd.f32 %v4324_v58, %v1430_v7  ;;  %v1431_v60 = vadd.f32 %v1347_v2, %v1301_v55 }
 0x2a7   : > { %v4398_v27 = vpop.permute.xlu1 %1228  ;;  %v1818_v9 = vsel %vm750_vm3, %v1816_v23, %v1817_v12 }
 0x2a8   : > { %v1469_v19 = vadd.f32 %v4324_v58, %v1431_v60  ;;  %1751 = vrot.lane.b32.xlu1 %v1526_v15, %s3369_s24  ;;  %v1580_v28 = vshrl.u32 %v1526_v15, 16  ;;  %v1500_v61 = vmax.f32 %v1468_v46, 0.0  ;;  %1861 = vrot.lane.b32.xlu0 %v1818_v9, %s3371_s14  ;;  %v1583_v4 = vshll.u32 %v1526_v15, 16 }
 0x2a9   : > { %v1353_v11 = vpop.permute.xlu0 %1352 }
 0x2aa   : > { %v1501_v3 = vmax.f32 %v1469_v19, 0.0  ;;  %v1582_v2 = vrot.slane %v1580_v28, 7 }
 0x2ab   : > { %v1355_v5 = vpop.permute.xlu1 %1354 }
 0x2ac   : > { %v1527_v50 = vpack.c.bf16 %v1501_v3, %v1500_v61  ;;  %v1585_v18 = vor.u32 %v1583_v4, %v1582_v2  ;;  %v1715_v62 = vsel %vm3828_vm4, %v1582_v2, 0 }
 0x2ad   : > { %v1349_v8 = vpop.permute.xlu0 %1348  ;;  %v1820_v42 = vrot.slane %v1715_v62, 1 }
 0x2ae   : > { %v1432_v14 = vadd.f32 %v1349_v8, %v1302_v13  ;;  %1753 = vrot.lane.b32.xlu0 %v1527_v50, %s3369_s24  ;;  %v1587_v39 = vshrl.u32 %v1527_v50, 16  ;;  %v4414_v10 = vsel %vm3828_vm4, 0, %v1585_v18  ;;  %v1590_v41 = vshll.u32 %v1527_v50, 16 }
 0x2af   : > { %v1351_v40 = vpop.permute.xlu1 %1350  ;;  %v1819_v47 = vrot.slane %v4414_v10, 1 }
 0x2b0   : > { %v1470_v21 = vadd.f32 %v4324_v58, %v1432_v14  ;;  %v1433_v49 = vadd.f32 %v1351_v40, %v1303_v54  ;;  %v1589_v44 = vrot.slane %v1587_v39, 7  ;;  %v1306_v54 = vadd.f32 %v4391_v34, %v4191_v25 }
 0x2b1   : > { %v1223_v52 = vpop.permute.xlu0 %1222  ;;  %v1821_v53 = vsel %vm750_vm3, %v1819_v47, %v1820_v42 }
 0x2b2   : > { %v1471_v22 = vadd.f32 %v4324_v58, %v1433_v49  ;;  %v1304_v57 = vadd.f32 %v4171_v20, %v1223_v52  ;;  %v1502_v7 = vmax.f32 %v1470_v21, 0.0  ;;  %1863 = vrot.lane.b32.xlu1 %v1821_v53, %s3371_s14  ;;  %v1592_v36 = vor.u32 %v1590_v41, %v1589_v44 }
 0x2b3   : > { %v1225_v55 = vpop.permute.xlu1 %1224  ;;  %v1716_v23 = vsel %vm3828_vm4, %v1589_v44, 0  ;;  %v1307_v21 = vadd.f32 %v4398_v27, %v4197_v26 }
 0x2b4   : > { %v1503_v15 = vmax.f32 %v1471_v22, 0.0  ;;  %v1434_v46 = vadd.f32 %v1353_v11, %v1304_v57  ;;  %v1305_v60 = vadd.f32 %v4177_v16, %v1225_v55  ;;  %v4429_v19 = vsel %vm3828_vm4, 0, %v1592_v36 }
 0x2b5   : > { %v4425_v12 = vpop.permute.xlu0 %1234  ;;  %v1822_v3 = vrot.slane %v4429_v19, 1  ;;  %v1823_v11 = vrot.slane %v1716_v23, 1 }
 0x2b6   : > { %v1528_v20 = vpack.c.bf16 %v1503_v15, %v1502_v7  ;;  %v1472_v9 = vadd.f32 %v4324_v58, %v1434_v46  ;;  %v1435_v28 = vadd.f32 %v1355_v5, %v1305_v60 }
 0x2b7   : > { %v4432_v61 = vpop.permute.xlu1 %1236  ;;  %v1824_v4 = vsel %vm750_vm3, %v1822_v3, %v1823_v11 }
 0x2b8   : > { %v1473_v16 = vadd.f32 %v4324_v58, %v1435_v28  ;;  %1755 = vrot.lane.b32.xlu1 %v1528_v20, %s3369_s24  ;;  %v1594_v13 = vshrl.u32 %v1528_v20, 16  ;;  %v1504_v50 = vmax.f32 %v1472_v9, 0.0  ;;  %1865 = vrot.lane.b32.xlu0 %v1824_v4, %s3371_s14  ;;  %v1597_v18 = vshll.u32 %v1528_v20, 16 }
 0x2b9   : > { %v1361_v2 = vpop.permute.xlu0 %1360 }
 0x2ba   : > { %v1505_v8 = vmax.f32 %v1473_v16, 0.0  ;;  %v1596_v5 = vrot.slane %v1594_v13, 7 }
 0x2bb   : > { %v1363_v62 = vpop.permute.xlu1 %1362 }
 0x2bc   : > { %v1529_v14 = vpack.c.bf16 %v1505_v8, %v1504_v50  ;;  %v1599_v40 = vor.u32 %v1597_v18, %v1596_v5  ;;  %v1717_v42 = vsel %vm3828_vm4, %v1596_v5, 0 }
 0x2bd   : > { %v1357_v39 = vpop.permute.xlu0 %1356  ;;  %v1826_v52 = vrot.slane %v1717_v42, 1 }
 0x2be   : > { %v1436_v49 = vadd.f32 %v1357_v39, %v1306_v54  ;;  %1757 = vrot.lane.b32.xlu0 %v1529_v14, %s3369_s24  ;;  %v1601_v47 = vshrl.u32 %v1529_v14, 16  ;;  %v4448_v41 = vsel %vm3828_vm4, 0, %v1599_v40  ;;  %v1604_v53 = vshll.u32 %v1529_v14, 16 }
 0x2bf   : > { %v1359_v44 = vpop.permute.xlu1 %1358  ;;  %v1825_v22 = vrot.slane %v4448_v41, 1  ;;  %v1310_v40 = vadd.f32 %v4425_v12, %v4207_v29 }
 0x2c0   : > { %v1474_v25 = vadd.f32 %v4324_v58, %v1436_v49  ;;  %v1437_v34 = vadd.f32 %v1359_v44, %v1307_v21  ;;  %v1603_v57 = vrot.slane %v1601_v47, 7  ;;  %v1311_v44 = vadd.f32 %v4432_v61, %v4213_v30 }
 0x2c1   : > { %v1231_v7 = vpop.permute.xlu0 %1230  ;;  %v1827_v55 = vsel %vm750_vm3, %v1825_v22, %v1826_v52 }
 0x2c2   : > { %v1475_v26 = vadd.f32 %v4324_v58, %v1437_v34  ;;  %v1308_v27 = vadd.f32 %v4187_v24, %v1231_v7  ;;  %v1506_v36 = vmax.f32 %v1474_v25, 0.0  ;;  %1867 = vrot.lane.b32.xlu1 %v1827_v55, %s3371_s14  ;;  %v1606_v46 = vor.u32 %v1604_v53, %v1603_v57 }
 0x2c3   : > { %v1233_v15 = vpop.permute.xlu1 %1232  ;;  %v1718_v9 = vsel %vm3828_vm4, %v1603_v57, 0 }
 0x2c4   : > { %v1507_v60 = vmax.f32 %v1475_v26, 0.0  ;;  %v1438_v23 = vadd.f32 %v1361_v2, %v1308_v27  ;;  %v1309_v20 = vadd.f32 %v4193_v17, %v1233_v15  ;;  %v4463_v3 = vsel %vm3828_vm4, 0, %v1606_v46 }
 0x2c5   : > { %v4459_v28 = vpop.permute.xlu0 %1242  ;;  %v1828_v13 = vrot.slane %v4463_v3, 1  ;;  %v1829_v2 = vrot.slane %v1718_v9, 1 }
 0x2c6   : > { %v1530_v24 = vpack.c.bf16 %v1507_v60, %v1506_v36  ;;  %v1476_v11 = vadd.f32 %v4324_v58, %v1438_v23  ;;  %v1439_v16 = vadd.f32 %v1363_v62, %v1309_v20 }
 0x2c7   : > { %v4466_v4 = vpop.permute.xlu1 %1244  ;;  %v1830_v50 = vsel %vm750_vm3, %v1828_v13, %v1829_v2 }
 0x2c8   : > { %v1477_v17 = vadd.f32 %v4324_v58, %v1439_v16  ;;  %1759 = vrot.lane.b32.xlu1 %v1530_v24, %s3369_s24  ;;  %v1608_v18 = vshrl.u32 %v1530_v24, 16  ;;  %v1508_v5 = vmax.f32 %v1476_v11, 0.0  ;;  %1869 = vrot.lane.b32.xlu0 %v1830_v50, %s3371_s14  ;;  %v1611_v14 = vshll.u32 %v1530_v24, 16 }
 0x2c9   : > { %v1369_v8 = vpop.permute.xlu0 %1368 }
 0x2ca   : > { %v1509_v54 = vmax.f32 %v1477_v17, 0.0  ;;  %v1610_v62 = vrot.slane %v1608_v18, 7 }
 0x2cb   : > { %v1371_v39 = vpop.permute.xlu1 %1370 }
 0x2cc   : > { %v1531_v42 = vpack.c.bf16 %v1509_v54, %v1508_v5  ;;  %v1613_v49 = vor.u32 %v1611_v14, %v1610_v62  ;;  %v1719_v47 = vsel %vm3828_vm4, %v1610_v62, 0 }
 0x2cd   : > { %v1365_v21 = vpop.permute.xlu0 %1364  ;;  %v1832_v57 = vrot.slane %v1719_v47, 1 }
 0x2ce   : > { %v1440_v52 = vadd.f32 %v1365_v21, %v1310_v40  ;;  %1761 = vrot.lane.b32.xlu0 %v1531_v42, %s3369_s24  ;;  %v1615_v25 = vshrl.u32 %v1531_v42, 16  ;;  %v4482_v22 = vsel %vm3828_vm4, 0, %v1613_v49  ;;  %v1618_v26 = vshll.u32 %v1531_v42, 16 }
 0x2cf   : > { %v1367_v34 = vpop.permute.xlu1 %1366  ;;  %v1831_v53 = vrot.slane %v4482_v22, 1 }
 0x2d0   : > { %v1478_v29 = vadd.f32 %v4324_v58, %v1440_v52  ;;  %v1441_v12 = vadd.f32 %v1367_v34, %v1311_v44  ;;  %v1617_v7 = vrot.slane %v1615_v25, 7  ;;  %v1315_v52 = vadd.f32 %v4466_v4, %v4229_v35 }
 0x2d1   : > { %v1239_v27 = vpop.permute.xlu0 %1238  ;;  %v1833_v55 = vsel %vm750_vm3, %v1831_v53, %v1832_v57 }
 0x2d2   : > { %v1479_v30 = vadd.f32 %v4324_v58, %v1441_v12  ;;  %v1312_v61 = vadd.f32 %v4203_v6, %v1239_v27  ;;  %v1510_v36 = vmax.f32 %v1478_v29, 0.0  ;;  %1871 = vrot.lane.b32.xlu1 %v1833_v55, %s3371_s14  ;;  %v1620_v46 = vor.u32 %v1618_v26, %v1617_v7 }
 0x2d3   : > { %v1241_v15 = vpop.permute.xlu1 %1240  ;;  %v1720_v9 = vsel %vm3828_vm4, %v1617_v7, 0 }
 0x2d4   : > { %v1511_v60 = vmax.f32 %v1479_v30, 0.0  ;;  %v1442_v23 = vadd.f32 %v1369_v8, %v1312_v61  ;;  %v1313_v20 = vadd.f32 %v4209_v31, %v1241_v15  ;;  %v4495_v11 = vsel %vm3828_vm4, 0, %v1620_v46 }
 0x2d5   : > { %v1251_v24 = vpop.permute.xlu0 %1250  ;;  %v1834_v17 = vrot.slane %v4495_v11, 1  ;;  %v1835_v50 = vrot.slane %v1720_v9, 1 }
 0x2d6   : > { %v1532_v6 = vpack.c.bf16 %v1511_v60, %v1510_v36  ;;  %v1480_v16 = vadd.f32 %v4324_v58, %v1442_v23  ;;  %v1443_v13 = vadd.f32 %v1371_v39, %v1313_v20  ;;  %v1314_v39 = vadd.f32 %v4459_v28, %v4223_v1 }
 0x2d7   : > { %v1253_v2 = vpop.permute.xlu1 %1252  ;;  %v1836_v31 = vsel %vm750_vm3, %v1834_v17, %v1835_v50  ;;  %v1318_v61 = vadd.f32 %v1251_v24, %v4239_v38 }
 0x2d8   : > { %v1481_v8 = vadd.f32 %v4324_v58, %v1443_v13  ;;  %1763 = vrot.lane.b32.xlu1 %v1532_v6, %s3369_s24  ;;  %v1622_v5 = vshrl.u32 %v1532_v6, 16  ;;  %v1512_v54 = vmax.f32 %v1480_v16, 0.0  ;;  %1873 = vrot.lane.b32.xlu0 %v1836_v31, %s3371_s14  ;;  %v1625_v62 = vshll.u32 %v1532_v6, 16 }
 0x2d9   : > { %v1377_v18 = vpop.permute.xlu0 %1376  ;;  %v1319_v13 = vadd.f32 %v1253_v2, %v4245_v0 }
 0x2da   : > { %v1513_v14 = vmax.f32 %v1481_v8, 0.0  ;;  %v1624_v42 = vrot.slane %v1622_v5, 7 }
 0x2db   : > { %v1379_v40 = vpop.permute.xlu1 %1378 }
 0x2dc   : > { %v1533_v21 = vpack.c.bf16 %v1513_v14, %v1512_v54  ;;  %v1627_v47 = vor.u32 %v1625_v62, %v1624_v42  ;;  %v1721_v44 = vsel %vm3828_vm4, %v1624_v42, 0 }
 0x2dd   : > { %v1373_v49 = vpop.permute.xlu0 %1372  ;;  %v1838_v12 = vrot.slane %v1721_v44, 1 }
 0x2de   : > { %v1444_v25 = vadd.f32 %v1373_v49, %v1314_v39  ;;  %1765 = vrot.lane.b32.xlu0 %v1533_v21, %s3369_s24  ;;  %v1629_v34 = vshrl.u32 %v1533_v21, 16  ;;  %v4512_v29 = vsel %vm3828_vm4, 0, %v1627_v47  ;;  %v1632_v26 = vshll.u32 %v1533_v21, 16 }
 0x2df   : > { %v1375_v57 = vpop.permute.xlu1 %1374  ;;  %v1837_v53 = vrot.slane %v4512_v29, 1 }
 0x2e0   : > { %v1482_v1 = vadd.f32 %v4324_v58, %v1444_v25  ;;  %v1445_v28 = vadd.f32 %v1375_v57, %v1315_v52  ;;  %v1631_v7 = vrot.slane %v1629_v34, 7 }
 0x2e1   : > { %v1247_v27 = vpop.permute.xlu0 %1246  ;;  %v1839_v30 = vsel %vm750_vm3, %v1837_v53, %v1838_v12 }
 0x2e2   : > { %v1483_v35 = vadd.f32 %v4324_v58, %v1445_v28  ;;  %v1316_v4 = vadd.f32 %v4219_v43, %v1247_v27  ;;  %v1514_v55 = vmax.f32 %v1482_v1, 0.0  ;;  %1875 = vrot.lane.b32.xlu1 %v1839_v30, %s3371_s14  ;;  %v1634_v15 = vor.u32 %v1632_v26, %v1631_v7 }
 0x2e3   : > { %v1249_v36 = vpop.permute.xlu1 %1248  ;;  %v1722_v20 = vsel %vm3828_vm4, %v1631_v7, 0 }
 0x2e4   : > { %v1515_v46 = vmax.f32 %v1483_v35, 0.0  ;;  %v1446_v60 = vadd.f32 %v1377_v18, %v1316_v4  ;;  %v1317_v23 = vadd.f32 %v4225_v33, %v1249_v36  ;;  %v4526_v43 = vsel %vm3828_vm4, 0, %v1634_v15 }
 0x2e5   : > { %v1381_v9 = vpop.permute.xlu0 %1380  ;;  %v1840_v50 = vrot.slane %v4526_v43, 1  ;;  %v1841_v8 = vrot.slane %v1722_v20, 1 }
 0x2e6   : > { %v1534_v6 = vpack.c.bf16 %v1515_v46, %v1514_v55  ;;  %v1484_v38 = vadd.f32 %v4324_v58, %v1446_v60  ;;  %v1447_v24 = vadd.f32 %v1379_v40, %v1317_v23  ;;  %v1448_v16 = vadd.f32 %v1381_v9, %v1318_v61 }
 0x2e7   : > { %v1383_v17 = vpop.permute.xlu1 %1382  ;;  %v1842_v5 = vsel %vm750_vm3, %v1840_v50, %v1841_v8 }
 0x2e8   : > { %v1485_v33 = vadd.f32 %v4324_v58, %v1447_v24  ;;  %1767 = vrot.lane.b32.xlu1 %v1534_v6, %s3369_s24  ;;  %v1486_v31 = vadd.f32 %v4324_v58, %v1448_v16  ;;  %v1449_v18 = vadd.f32 %v1383_v17, %v1319_v13  ;;  %v1636_v14 = vshrl.u32 %v1534_v6, 16  ;;  %1877 = vrot.lane.b32.xlu0 %v1842_v5, %s3371_s14 }
 0x2e9   : > { %v1255_v54 = vpop.permute.xlu0 %1254  ;;  %v1516_v62 = vmax.f32 %v1484_v38, 0.0  ;;  %v1639_v0 = vshll.u32 %v1534_v6, 16 }
 0x2ea   : > { %v1517_v40 = vmax.f32 %v1485_v33, 0.0  ;;  %v1487_v2 = vadd.f32 %v4324_v58, %v1449_v18  ;;  %v1638_v39 = vrot.slane %v1636_v14, 7  ;;  %v1320_v21 = vadd.f32 %v4235_v37, %v1255_v54 }
 0x2eb   : > { %v1257_v42 = vpop.permute.xlu1 %1256  ;;  %v1518_v47 = vmax.f32 %v1486_v31, 0.0 }
 0x2ec   : > { %v1535_v49 = vpack.c.bf16 %v1517_v40, %v1516_v62  ;;  %v1519_v44 = vmax.f32 %v1487_v2, 0.0  ;;  %v1641_v25 = vor.u32 %v1639_v0, %v1638_v39  ;;  %v1723_v34 = vsel %vm3828_vm4, %v1638_v39, 0 }
 0x2ed   : > { %v1385_v52 = vpop.permute.xlu0 %1384  ;;  %v1321_v57 = vadd.f32 %v4241_v45, %v1257_v42  ;;  %v1844_v26 = vrot.slane %v1723_v34, 1 }
 0x2ee   : > { %v1450_v12 = vadd.f32 %v1385_v52, %v1320_v21  ;;  %1769 = vrot.lane.b32.xlu0 %v1535_v49, %s3369_s24  ;;  %v1643_v1 = vshrl.u32 %v1535_v49, 16  ;;  %v1536_v28 = vpack.c.bf16 %v1519_v44, %v1518_v47  ;;  %v1646_v53 = vshll.u32 %v1535_v49, 16 }
 0x2ef   : > { %v1387_v7 = vpop.permute.xlu1 %1386  ;;  %v4544_v37 = vsel %vm3828_vm4, 0, %v1641_v25 }
 0x2f0   : > { %v1488_v27 = vadd.f32 %v4324_v58, %v1450_v12  ;;  %v1451_v35 = vadd.f32 %v1387_v7, %v1321_v57  ;;  %v1843_v4 = vrot.slane %v4544_v37, 1  ;;  %v1645_v30 = vrot.slane %v1643_v1, 7 }
 0x2f1   : > { %v1650_v61 = vshrl.u32 %v1536_v28, 16  ;;  %v1653_v15 = vshll.u32 %v1536_v28, 16 }
 0x2f2   : > { %v1489_v45 = vadd.f32 %v4324_v58, %v1451_v35  ;;  %v1845_v55 = vsel %vm750_vm3, %v1843_v4, %v1844_v26  ;;  %v1648_v36 = vor.u32 %v1646_v53, %v1645_v30  ;;  %v1724_v46 = vsel %vm3828_vm4, %v1645_v30, 0 }
 0x2f3   : > { %1879 = vrot.lane.b32.xlu1 %v1845_v55, %s3371_s14  ;;  %v1652_v60 = vrot.slane %v1650_v61, 7  ;;  %v1520_v23 = vmax.f32 %v1488_v27, 0.0  ;;  %v1847_v38 = vrot.slane %v1724_v46, 1 }
 0x2f4   : > { %v1521_v20 = vmax.f32 %v1489_v45, 0.0  ;;  %v4555_v9 = vsel %vm3828_vm4, 0, %v1648_v36 }
 0x2f5   : > { %v1846_v6 = vrot.slane %v4555_v9, 1  ;;  %v1655_v58 = vor.u32 %v1653_v15, %v1652_v60  ;;  %v1725_v24 = vsel %vm3828_vm4, %v1652_v60, 0 }
 0x2f6   : > { %v1537_v16 = vpack.c.bf16 %v1521_v20, %v1520_v23  ;;  %v1850_v33 = vrot.slane %v1725_v24, 1 }
 0x2f7   : > { %1771 = vrot.lane.b32.xlu1 %v1536_v28, %s3369_s24  ;;  %v1848_v13 = vsel %vm750_vm3, %v1846_v6, %v1847_v38  ;;  %v4564_v17 = vsel %vm3828_vm4, 0, %v1655_v58 }
 0x2f8   : > { %v1657_v50 = vshrl.u32 %v1537_v16, 16  ;;  %1881 = vrot.lane.b32.xlu0 %v1848_v13, %s3371_s14  ;;  %v1849_v8 = vrot.slane %v4564_v17, 1  ;;  %v1660_v18 = vshll.u32 %v1537_v16, 16 }
 0x2fa   : > { %v1659_v31 = vrot.slane %v1657_v50, 7  ;;  %v1851_v5 = vsel %vm750_vm3, %v1849_v8, %v1850_v33  ;;  %v1744_v2 = vpop.permute.xlu0 %1743 }
 0x2fb   : > { %1883 = vrot.lane.b32.xlu1 %v1851_v5, %s3371_s14  ;;  %v1889_v39 = vsel %vm831_vm5, %v4346_v63, %v1744_v2 }
 0x2fc   : > { %1773 = vrot.lane.b32.xlu0 %v1537_v16, %s3369_s24  ;;  %v1662_v54 = vor.u32 %v1660_v18, %v1659_v31  ;;  %v1726_v14 = vsel %vm3828_vm4, %v1659_v31, 0 }
 0x2fd   : > { %v1853_v0 = vrot.slane %v1726_v14, 1 }
 0x2fe   : > { %v4575_v62 = vsel %vm3828_vm4, 0, %v1662_v54 }
 0x2ff   : > { %v1852_v40 = vrot.slane %v4575_v62, 1 }
 0x300   : > { %v1746_v47 = vpop.permute.xlu0 %1745 }
 0x301   : > { %v1854_v42 = vsel %vm750_vm3, %v1852_v40, %v1853_v0  ;;  %v1892_v51 = vsel %vm831_vm5, %v4359_v48, %v1746_v47 }
 0x302   : > { %1885 = vrot.lane.b32.xlu1 %v1854_v42, %s3371_s14 }
 0x304   : > { %v1856_v21 = vpop.permute.xlu1 %1855 }
 0x305   : > { %v1936_v49 = vsel %vm880_vm6, %v1889_v39, %v1856_v21 }
 0x306   : > { %2938 = vmatmul.mubr.msk.bf16.vlgmr.msra.gmra.mrb[0].mxu1 %vm949_vm7, %v1936_v49 }
 0x30a   : > { %v1858_v44 = vpop.permute.xlu0 %1857  ;;  %v1748_v25 = vpop.permute.xlu1 %1747 }
 0x30b   : > { %v1938_v52 = vsel %vm880_vm6, %v1892_v51, %v1858_v44  ;;  %v1895_v34 = vsel %vm831_vm5, %v4380_v32, %v1748_v25 }
 0x30c   : > { %2941 = vmatprep.mubr.msk.bf16.mxu1 %vm949_vm7, %v1938_v52 }
 0x310   : > { %v1750_v12 = vpop.permute.xlu0 %1749 }
 0x311   : > { %v1898_v1 = vsel %vm831_vm5, %v4395_v59, %v1750_v12 }
 0x314   : > { %v1860_v57 = vpop.permute.xlu1 %1859 }
 0x315   : > { %v1940_v63 = vsel %vm880_vm6, %v1895_v34, %v1860_v57 }
 0x316   : > { %2942 = vmatmul.mubr.msk.bf16.gmra.mrb[4].mxu1 %vm949_vm7, %v1940_v63 }
 0x31a   : > { %v1862_v28 = vpop.permute.xlu0 %1861  ;;  %v1752_v53 = vpop.permute.xlu1 %1751 }
 0x31b   : > { %v1942_v48 = vsel %vm880_vm6, %v1898_v1, %v1862_v28  ;;  %v1901_v7 = vsel %vm831_vm5, %v4414_v10, %v1752_v53 }
 0x31c   : > { %2945 = vmatprep.mubr.msk.bf16.mxu1 %vm949_vm7, %v1942_v48 }
 0x320   : > { %v1754_v27 = vpop.permute.xlu0 %1753 }
 0x321   : > { %v1904_v35 = vsel %vm831_vm5, %v4429_v19, %v1754_v27 }
 0x324   : > { %v1864_v26 = vpop.permute.xlu1 %1863 }
 0x325   : > { %v1944_v32 = vsel %vm880_vm6, %v1901_v7, %v1864_v26 }
 0x326   : > { %2946 = vmatmul.mubr.msk.bf16.gmra.mrb[8].mxu1 %vm949_vm7, %v1944_v32 }
 0x32a   : > { %v1866_v4 = vpop.permute.xlu0 %1865  ;;  %v1756_v30 = vpop.permute.xlu1 %1755 }
 0x32b   : > { %v1946_v59 = vsel %vm880_vm6, %v1904_v35, %v1866_v4  ;;  %v1907_v61 = vsel %vm831_vm5, %v4448_v41, %v1756_v30 }
 0x32c   : > { %2949 = vmatprep.mubr.msk.bf16.mxu1 %vm949_vm7, %v1946_v59 }
 0x330   : > { %v1758_v55 = vpop.permute.xlu0 %1757 }
 0x331   : > { %v1910_v36 = vsel %vm831_vm5, %v4463_v3, %v1758_v55 }
 0x334   : > { %v1868_v45 = vpop.permute.xlu1 %1867 }
 0x335   : > { %v1948_v10 = vsel %vm880_vm6, %v1907_v61, %v1868_v45 }
 0x336   : > { %2950 = vmatmul.mubr.msk.bf16.gmra.mrb[12].mxu1 %vm949_vm7, %v1948_v10 }
 0x33a   : > { %v1870_v15 = vpop.permute.xlu0 %1869  ;;  %v1760_v46 = vpop.permute.xlu1 %1759 }
 0x33b   : > { %v1950_v19 = vsel %vm880_vm6, %v1910_v36, %v1870_v15  ;;  %v1913_v60 = vsel %vm831_vm5, %v4482_v22, %v1760_v46 }
 0x33c   : > { %2953 = vmatprep.mubr.msk.bf16.mxu1 %vm949_vm7, %v1950_v19 }
 0x340   : > { %v1762_v20 = vpop.permute.xlu0 %1761 }
 0x341   : > { %v1916_v6 = vsel %vm831_vm5, %v4495_v11, %v1762_v20 }
 0x344   : > { %v1872_v23 = vpop.permute.xlu1 %1871 }
 0x345   : > { %v1952_v41 = vsel %vm880_vm6, %v1913_v60, %v1872_v23 }
 0x346   : > { %2954 = vmatmul.mubr.msk.bf16.gmra.mrb[16].mxu1 %vm949_vm7, %v1952_v41 }
 0x34a   : > { %v1874_v38 = vpop.permute.xlu0 %1873  ;;  %v1764_v58 = vpop.permute.xlu1 %1763 }
 0x34b   : > { %v1954_v3 = vsel %vm880_vm6, %v1916_v6, %v1874_v38  ;;  %v1919_v24 = vsel %vm831_vm5, %v4512_v29, %v1764_v58 }
 0x34c   : > { %2957 = vmatprep.mubr.msk.bf16.mxu1 %vm949_vm7, %v1954_v3 }
 0x350   : > { %v1766_v13 = vpop.permute.xlu0 %1765 }
 0x351   : > { %v1922_v50 = vsel %vm831_vm5, %v4526_v43, %v1766_v13  ;;  %v4837_v13 = vld [vmem:[%s359_s8] ss:$0 sm:$0xff]  ;;  %s3373_s8 = smov [#allocation8]  }
 0x352   : > { %s3238_s1 = sshll.u32 %s3373_s8, 4  ;;  %s3239_s1 = int_to_ptr.vmem [resolvable:$false] %s3238_s1 }
 0x353   : > { %s3240_s24 = scalar_lea.vmem %s3239_s1, 8192  ;;  %p3241_p9 = scmp.lt.s32.totalorder %s5000_s29, %s3239_s1 }
 0x354   : > { %v1876_v16 = vpop.permute.xlu1 %1875  ;;  %p3242_p5 = scmp.lt.s32.totalorder %s3240_s24, %s3234_s6 }
 0x355   : > { %v1956_v22 = vsel %vm880_vm6, %v1919_v24, %v1876_v16 }
 0x356   : > { %2958 = vmatmul.mubr.msk.bf16.gmra.mrb[20].mxu1 %vm949_vm7, %v1956_v22  ;;  %p3243_p1 = por %p3242_p5, %p3241_p9 }
 0x358   : > { %p3244_p12 = pnand %p3243_p1, %p3237_p4 }
 0x35a   : > { %v1878_v8 = vpop.permute.xlu0 %1877  ;;  %v1768_v33 = vpop.permute.xlu1 %1767 }
 0x35b   : > { %v1958_v11 = vsel %vm880_vm6, %v1922_v50, %v1878_v8  ;;  %v1925_v31 = vsel %vm831_vm5, %v4544_v37, %v1768_v33 }
 0x35c   : > { %2961 = vmatprep.mubr.msk.bf16.mxu1 %vm949_vm7, %v1958_v11 }
 0x360   : > { %v1770_v29 = vpop.permute.xlu0 %1769 }
 0x361   : > { %v1928_v14 = vsel %vm831_vm5, %v4555_v9, %v1770_v29 }
 0x365   : > { %v1880_v18 = vpop.permute.xlu1 %1879 }
 0x366   : > { %v1960_v5 = vsel %vm880_vm6, %v1925_v31, %v1880_v18 }
 0x367   : > { %2962 = vmatmul.mubr.msk.bf16.gmra.mrb[24].mxu1 %vm949_vm7, %v1960_v5 }
 0x369   : > { %v1772_v54 = vpop.permute.xlu1 %1771 }
 0x36a   : > { %v1882_v43 = vpop.permute.xlu0 %1881  ;;  %v1931_v0 = vsel %vm831_vm5, %v4564_v17, %v1772_v54 }
 0x36b   : > { %v1962_v40 = vsel %vm880_vm6, %v1928_v14, %v1882_v43  ;;  %v3112_v43 = vld [vmem:[%s3712_s5 + $0x10] sm:$0xff] }
 0x36c   : > { %2965 = vmatprep.mubr.msk.bf16.mxu1 %vm949_vm7, %v1962_v40 }
 0x36d   : > { %v1884_v2 = vpop.permute.xlu1 %1883 }
 0x36e   : > { %v1964_v37 = vsel %vm880_vm6, %v1931_v0, %v1884_v2  ;;  %v1774_v42 = vpop.permute.xlu0 %1773 }
 0x36f   : > { %2966 = vmatmul.mubr.msk.bf16.gmra.mrb[28].mxu1 %vm949_vm7, %v1964_v37  ;;  %v1934_v39 = vsel %vm831_vm5, %v4575_v62, %v1774_v42 }
 0x374   : > { %v1886_v21 = vpop.permute.xlu1 %1885 }
 0x375   : > { %v1966_v9 = vsel %vm880_vm6, %v1934_v39, %v1886_v21  ;;  %v3113_v39 = vld [vmem:[%s3712_s5 + $0x18] sm:$0xff] }
 0x376   : > { %2969 = vmatprep.mubr.msk.bf16.mxu1 %vm949_vm7, %v1966_v9  ;;  %v3114_v9 = vld [vmem:[%s3712_s5] sm:$0xff] }
 0x377   : > { %2970 = vmatmul.mubr.bf16.gmra.mrb[32].mxu1 %v3370_v56 }
 0x3d9   : > { %v4645_v49 = vpop.f32.mrb[0].mxu1 }
 0x3da   : > { %2244 = vrot.lane.b32.xlu0 %v4645_v49, %s3372_s27  ;;  %v4649_v17 = vpop.f32.mrb[1].mxu1 }
 0x3db   : > { %v4651_v47 = vpop.f32.mrb[2].mxu1 }
 0x3dc   : > { %2246 = vrot.lane.b32.xlu1 %v4651_v47, %s3372_s27  ;;  %v4655_v62 = vpop.f32.mrb[3].mxu1 }
 0x3e9   : > { %v4657_v51 = vpop.f32.mrb[4].mxu1 }
 0x3ea   : > { %2252 = vrot.lane.b32.xlu0 %v4657_v51, %s3372_s27  ;;  %v4661_v56 = vpop.f32.mrb[5].mxu1 }
 0x3eb   : > { %v4663_v44 = vpop.f32.mrb[6].mxu1 }
 0x3ec   : > { %2254 = vrot.lane.b32.xlu1 %v4663_v44, %s3372_s27  ;;  %v4667_v52 = vpop.f32.mrb[7].mxu1 }
 0x3ee   : > { %2378 = vrot.lane.b32.xlu0 %v4657_v51, %s3371_s14 }
 0x3f0   : > { %2380 = vrot.lane.b32.xlu1 %v4663_v44, %s3371_s14 }
 0x3f2   : > { %2248 = vrot.lane.b32.xlu0 %v4661_v56, %s3372_s27 }
 0x3f4   : > { %2250 = vrot.lane.b32.xlu1 %v4667_v52, %s3372_s27 }
 0x3f6   : > { %2374 = vrot.lane.b32.xlu0 %v4661_v56, %s3371_s14 }
 0x3f8   : > { %2376 = vrot.lane.b32.xlu1 %v4667_v52, %s3371_s14 }
 0x3f9   : > { %v4681_v25 = vpop.f32.mrb[8].mxu1 }
 0x3fa   : > { %2260 = vrot.lane.b32.xlu0 %v4681_v25, %s3372_s27  ;;  %v4685_v34 = vpop.f32.mrb[9].mxu1 }
 0x3fb   : > { %v4687_v57 = vpop.f32.mrb[10].mxu1 }
 0x3fc   : > { %2262 = vrot.lane.b32.xlu1 %v4687_v57, %s3372_s27  ;;  %v4691_v63 = vpop.f32.mrb[11].mxu1 }
 0x3fe   : > { %2386 = vrot.lane.b32.xlu0 %v4681_v25, %s3371_s14 }
 0x400   : > { %2388 = vrot.lane.b32.xlu1 %v4687_v57, %s3371_s14 }
 0x402   : > { %2256 = vrot.lane.b32.xlu0 %v4685_v34, %s3372_s27 }
 0x404   : > { %2258 = vrot.lane.b32.xlu1 %v4691_v63, %s3372_s27 }
 0x406   : > { %2382 = vrot.lane.b32.xlu0 %v4685_v34, %s3371_s14 }
 0x408   : > { %2384 = vrot.lane.b32.xlu1 %v4691_v63, %s3371_s14 }
 0x409   : > { %v4705_v12 = vpop.f32.mrb[12].mxu1 }
 0x40a   : > { %2268 = vrot.lane.b32.xlu0 %v4705_v12, %s3372_s27  ;;  %v4709_v1 = vpop.f32.mrb[13].mxu1 }
 0x40b   : > { %v4711_v28 = vpop.f32.mrb[14].mxu1 }
 0x40c   : > { %2270 = vrot.lane.b32.xlu1 %v4711_v28, %s3372_s27  ;;  %v4715_v48 = vpop.f32.mrb[15].mxu1 }
 0x40e   : > { %2394 = vrot.lane.b32.xlu0 %v4705_v12, %s3371_s14 }
 0x410   : > { %2396 = vrot.lane.b32.xlu1 %v4711_v28, %s3371_s14 }
 0x412   : > { %2264 = vrot.lane.b32.xlu0 %v4709_v1, %s3372_s27 }
 0x414   : > { %2266 = vrot.lane.b32.xlu1 %v4715_v48, %s3372_s27 }
 0x416   : > { %2390 = vrot.lane.b32.xlu0 %v4709_v1, %s3371_s14 }
 0x418   : > { %2392 = vrot.lane.b32.xlu1 %v4715_v48, %s3371_s14 }
 0x419   : > { %v4729_v53 = vpop.f32.mrb[16].mxu1 }
 0x41a   : > { %2276 = vrot.lane.b32.xlu0 %v4729_v53, %s3372_s27  ;;  %v4733_v7 = vpop.f32.mrb[17].mxu1 }
 0x41b   : > { %v4735_v26 = vpop.f32.mrb[18].mxu1 }
 0x41c   : > { %2278 = vrot.lane.b32.xlu1 %v4735_v26, %s3372_s27  ;;  %v4739_v32 = vpop.f32.mrb[19].mxu1 }
 0x41e   : > { %2402 = vrot.lane.b32.xlu0 %v4729_v53, %s3371_s14 }
 0x420   : > { %2404 = vrot.lane.b32.xlu1 %v4735_v26, %s3371_s14 }
 0x422   : > { %2272 = vrot.lane.b32.xlu0 %v4733_v7, %s3372_s27 }
 0x424   : > { %2274 = vrot.lane.b32.xlu1 %v4739_v32, %s3372_s27 }
 0x426   : > { %2398 = vrot.lane.b32.xlu0 %v4733_v7, %s3371_s14 }
 0x428   : > { %2400 = vrot.lane.b32.xlu1 %v4739_v32, %s3371_s14 }
 0x429   : > { %v4753_v27 = vpop.f32.mrb[20].mxu1 }
 0x42a   : > { %2284 = vrot.lane.b32.xlu0 %v4753_v27, %s3372_s27  ;;  %v4757_v35 = vpop.f32.mrb[21].mxu1 }
 0x42b   : > { %v4759_v4 = vpop.f32.mrb[22].mxu1 }
 0x42c   : > { %2286 = vrot.lane.b32.xlu1 %v4759_v4, %s3372_s27  ;;  %v4763_v59 = vpop.f32.mrb[23].mxu1 }
 0x42e   : > { %2410 = vrot.lane.b32.xlu0 %v4753_v27, %s3371_s14 }
 0x430   : > { %2412 = vrot.lane.b32.xlu1 %v4759_v4, %s3371_s14 }
 0x432   : > { %2280 = vrot.lane.b32.xlu0 %v4757_v35, %s3372_s27 }
 0x434   : > { %2282 = vrot.lane.b32.xlu1 %v4763_v59, %s3372_s27 }
 0x436   : > { %2406 = vrot.lane.b32.xlu0 %v4757_v35, %s3371_s14 }
 0x438   : > { %2408 = vrot.lane.b32.xlu1 %v4763_v59, %s3371_s14 }
 0x43a   : > { %v4777_v30 = vpop.f32.mrb[24].mxu1 }
 0x43b   : > { %2292 = vrot.lane.b32.xlu0 %v4777_v30, %s3372_s27  ;;  %v4781_v61 = vpop.f32.mrb[25].mxu1 }
 0x43c   : > { %v4783_v45 = vpop.f32.mrb[26].mxu1 }
 0x43d   : > { %2294 = vrot.lane.b32.xlu1 %v4783_v45, %s3372_s27  ;;  %v4787_v10 = vpop.f32.mrb[27].mxu1 }
 0x43f   : > { %2418 = vrot.lane.b32.xlu0 %v4777_v30, %s3371_s14 }
 0x441   : > { %2420 = vrot.lane.b32.xlu1 %v4783_v45, %s3371_s14 }
 0x442   : > { %v4793_v55 = vpop.f32.mrb[28].mxu1 }
 0x443   : > { %2288 = vrot.lane.b32.xlu0 %v4781_v61, %s3372_s27  ;;  %v4797_v36 = vpop.f32.mrb[29].mxu1 }
 0x444   : > { %v4799_v15 = vpop.f32.mrb[30].mxu1 }
 0x445   : > { %2290 = vrot.lane.b32.xlu1 %v4787_v10, %s3372_s27  ;;  %v4803_v19 = vpop.f32.mrb[31].mxu1 }
 0x447   : > { %2414 = vrot.lane.b32.xlu0 %v4781_v61, %s3371_s14 }
 0x449   : > { %2416 = vrot.lane.b32.xlu1 %v4787_v10, %s3371_s14 }
 0x44a   : > { %v2971_v46 = vpop.f32.mrb[32].mxu1 }
 0x44b   : > { %2300 = vrot.lane.b32.xlu0 %v4793_v55, %s3372_s27  ;;  %v2197_v60 = vpop.f32.mrb[33].mxu1 }
 0x44c   : > { %v2972_v23 = vpop.f32.mrb[34].mxu1  ;;  %v2245_v20 = vpop.permute.xlu0 %2244 }
 0x44d   : > { %2302 = vrot.lane.b32.xlu1 %v4799_v15, %s3372_s27  ;;  %v2200_v41 = vpop.f32.mrb[35].mxu1  ;;  %v2340_v8 = vadd.f32 %v2245_v20, %v4649_v17 }
 0x44e   : > { %v2247_v6 = vpop.permute.xlu1 %2246 }
 0x44f   : > { %2426 = vrot.lane.b32.xlu0 %v4793_v55, %s3371_s14  ;;  %v2341_v18 = vadd.f32 %v2247_v6, %v4655_v62  ;;  %v3115_v62 = vld [vmem:[%s3712_s5 + $0x8] sm:$0xff] }
 0x451   : > { %2428 = vrot.lane.b32.xlu1 %v4799_v15, %s3371_s14 }
 0x453   : > { %2296 = vrot.lane.b32.xlu0 %v4797_v36, %s3372_s27 }
 0x455   : > { %2298 = vrot.lane.b32.xlu1 %v4803_v19, %s3372_s27 }
 0x457   : > { %2422 = vrot.lane.b32.xlu0 %v4797_v36, %s3371_s14 }
 0x459   : > { %2424 = vrot.lane.b32.xlu1 %v4803_v19, %s3371_s14 }
 0x45b   : > { %2304 = vrot.lane.b32.xlu0 %v2197_v60, %s3372_s27 }
 0x45c   : > { %v2253_v38 = vpop.permute.xlu0 %2252 }
 0x45d   : > { %2306 = vrot.lane.b32.xlu1 %v2200_v41, %s3372_s27 }
 0x45e   : > { %v2255_v3 = vpop.permute.xlu1 %2254 }
 0x45f   : > { %2430 = vrot.lane.b32.xlu0 %v2197_v60, %s3371_s14 }
 0x460   : > { %v2379_v58 = vpop.permute.xlu0 %2378 }
 0x461   : > { %2432 = vrot.lane.b32.xlu1 %v2200_v41, %s3371_s14 }
 0x462   : > { %v2381_v24 = vpop.permute.xlu1 %2380 }
 0x463   : > { %2434 = vrot.lane.b32.xlu0 %v2971_v46, %s3371_s14 }
 0x464   : > { %v2249_v16 = vpop.permute.xlu0 %2248 }
 0x465   : > { %2436 = vrot.lane.b32.xlu1 %v2972_v23, %s3371_s14  ;;  %v2342_v22 = vadd.f32 %v4645_v49, %v2249_v16 }
 0x466   : > { %v2251_v50 = vpop.permute.xlu1 %2250 }
 0x467   : > { %v2472_v11 = vadd.f32 %v2379_v58, %v2342_v22  ;;  %v2343_v33 = vadd.f32 %v4651_v47, %v2251_v50  ;;  %v2344_v58 = vadd.f32 %v2253_v38, %v4661_v56  ;;  %v2345_v50 = vadd.f32 %v2255_v3, %v4667_v52  ;;  %v3117_v52 = vld [vmem:[%s3712_s5 + $0x38] sm:$0xff] }
 0x468   : > { %v2375_v31 = vpop.permute.xlu0 %2374 }
 0x469   : > { %v2510_v29 = vadd.f32 %v4837_v13, %v2472_v11  ;;  %v2473_v5 = vadd.f32 %v2381_v24, %v2343_v33  ;;  %v2470_v54 = vadd.f32 %v2375_v31, %v2340_v8 }
 0x46a   : > { %v2377_v14 = vpop.permute.xlu1 %2376 }
 0x46b   : > { %v2542_v40 = vadd.f32 %v3112_v43, %v2510_v29  ;;  %v2511_v0 = vadd.f32 %v4837_v13, %v2473_v5  ;;  %v2508_v2 = vadd.f32 %v4837_v13, %v2470_v54  ;;  %v2471_v37 = vadd.f32 %v2377_v14, %v2341_v18  ;;  %v3118_v5 = vld [vmem:[%s3712_s5 + $0x20] sm:$0xff] }
 0x46c   : > { %v2261_v42 = vpop.permute.xlu0 %2260 }
 0x46d   : > { %2574 = vst.msk [vmem:[%s3712_s5 + $0x10] sm:$0xff] %vm831_vm5, %v2542_v40  ;;  %v2543_v21 = vadd.f32 %v3113_v39, %v2511_v0  ;;  %v2540_v49 = vadd.f32 %v3114_v9, %v2508_v2  ;;  %v2509_v17 = vadd.f32 %v4837_v13, %v2471_v37  ;;  %v3119_v40 = vld [vmem:[%s3712_s5 + $0x28] sm:$0xff] }
 0x46e   : > { %v2263_v47 = vpop.permute.xlu1 %2262 }
 0x46f   : > { %2575 = vst.msk [vmem:[%s3712_s5 + $0x18] sm:$0xff] %vm831_vm5, %v2543_v21  ;;  %2572 = vst.msk [vmem:[%s3712_s5] sm:$0xff] %vm831_vm5, %v2540_v49  ;;  %v2541_v46 = vadd.f32 %v3115_v62, %v2509_v17  ;;  %v2348_v49 = vadd.f32 %v2261_v42, %v4685_v34 }
 0x470   : > { %v2387_v60 = vpop.permute.xlu0 %2386 }
 0x471   : > { %2573 = vst.msk [vmem:[%s3712_s5 + $0x8] sm:$0xff] %vm831_vm5, %v2541_v46 }
 0x472   : > { %v2389_v23 = vpop.permute.xlu1 %2388 }
 0x474   : > { %v2257_v41 = vpop.permute.xlu0 %2256 }
 0x475   : > { %v2346_v20 = vadd.f32 %v4657_v51, %v2257_v41  ;;  %v3116_v51 = vld [vmem:[%s3712_s5 + $0x30] sm:$0xff] }
 0x476   : > { %v2259_v6 = vpop.permute.xlu1 %2258 }
 0x477   : > { %v2476_v24 = vadd.f32 %v2387_v60, %v2346_v20  ;;  %v2347_v16 = vadd.f32 %v4663_v44, %v2259_v6  ;;  %v2349_v60 = vadd.f32 %v2263_v47, %v4691_v63  ;;  %v3121_v63 = vld [vmem:[%s3712_s5 + $0x58] sm:$0xff] }
 0x478   : > { %v2383_v22 = vpop.permute.xlu0 %2382 }
 0x479   : > { %v2514_v8 = vadd.f32 %v4837_v13, %v2476_v24  ;;  %v2477_v11 = vadd.f32 %v2389_v23, %v2347_v16  ;;  %v2474_v33 = vadd.f32 %v2383_v22, %v2344_v58  ;;  %v3122_v16 = vld [vmem:[%s3712_s5 + $0x40] sm:$0xff] }
 0x47a   : > { %v2385_v31 = vpop.permute.xlu1 %2384 }
 0x47b   : > { %v2546_v18 = vadd.f32 %v3116_v51, %v2514_v8  ;;  %v2515_v56 = vadd.f32 %v4837_v13, %v2477_v11  ;;  %v2512_v38 = vadd.f32 %v4837_v13, %v2474_v33  ;;  %v2475_v44 = vadd.f32 %v2385_v31, %v2345_v50  ;;  %v3123_v11 = vld [vmem:[%s3712_s5 + $0x48] sm:$0xff] }
 0x47c   : > { %v2269_v29 = vpop.permute.xlu0 %2268 }
 0x47d   : > { %2578 = vst.msk [vmem:[%s3712_s5 + $0x30] sm:$0xff] %vm831_vm5, %v2546_v18  ;;  %v2547_v3 = vadd.f32 %v3117_v52, %v2515_v56  ;;  %v2544_v54 = vadd.f32 %v3118_v5, %v2512_v38  ;;  %v2513_v14 = vadd.f32 %v4837_v13, %v2475_v44  ;;  %v2352_v44 = vadd.f32 %v2269_v29, %v4709_v1 }
 0x47e   : > { %v2271_v43 = vpop.permute.xlu1 %2270 }
 0x47f   : > { %2579 = vst.msk [vmem:[%s3712_s5 + $0x38] sm:$0xff] %vm831_vm5, %v2547_v3  ;;  %2576 = vst.msk [vmem:[%s3712_s5 + $0x20] sm:$0xff] %vm831_vm5, %v2544_v54  ;;  %v2545_v0 = vadd.f32 %v3119_v40, %v2513_v14  ;;  %v2353_v54 = vadd.f32 %v2271_v43, %v4715_v48  ;;  %v3125_v48 = vld [vmem:[%s3712_s5 + $0x78] sm:$0xff] }
 0x480   : > { %v2395_v2 = vpop.permute.xlu0 %2394 }
 0x481   : > { %2577 = vst.msk [vmem:[%s3712_s5 + $0x28] sm:$0xff] %vm831_vm5, %v2545_v0 }
 0x482   : > { %v2397_v37 = vpop.permute.xlu1 %2396 }
 0x484   : > { %v2265_v39 = vpop.permute.xlu0 %2264 }
 0x485   : > { %v2350_v21 = vadd.f32 %v4681_v25, %v2265_v39  ;;  %v3120_v25 = vld [vmem:[%s3712_s5 + $0x50] sm:$0xff] }
 0x486   : > { %v2267_v9 = vpop.permute.xlu1 %2266 }
 0x487   : > { %v2480_v17 = vadd.f32 %v2395_v2, %v2350_v21  ;;  %v2351_v62 = vadd.f32 %v4687_v57, %v2267_v9  ;;  %v3126_v21 = vld [vmem:[%s3712_s5 + $0x60] sm:$0xff] }
 0x488   : > { %v2391_v46 = vpop.permute.xlu0 %2390 }
 0x489   : > { %v2518_v23 = vadd.f32 %v4837_v13, %v2480_v17  ;;  %v2481_v41 = vadd.f32 %v2397_v37, %v2351_v62  ;;  %v2478_v20 = vadd.f32 %v2391_v46, %v2348_v49  ;;  %v3127_v62 = vld [vmem:[%s3712_s5 + $0x68] sm:$0xff] }
 0x48a   : > { %v2393_v6 = vpop.permute.xlu1 %2392 }
 0x48b   : > { %v2550_v58 = vadd.f32 %v3120_v25, %v2518_v23  ;;  %v2519_v34 = vadd.f32 %v4837_v13, %v2481_v41  ;;  %v2516_v42 = vadd.f32 %v4837_v13, %v2478_v20  ;;  %v2479_v57 = vadd.f32 %v2393_v6, %v2349_v60 }
 0x48c   : > { %v2277_v24 = vpop.permute.xlu0 %2276 }
 0x48d   : > { %2582 = vst.msk [vmem:[%s3712_s5 + $0x50] sm:$0xff] %vm831_vm5, %v2550_v58  ;;  %v2551_v47 = vadd.f32 %v3121_v63, %v2519_v34  ;;  %v2548_v22 = vadd.f32 %v3122_v16, %v2516_v42  ;;  %v2517_v50 = vadd.f32 %v4837_v13, %v2479_v57  ;;  %v2356_v25 = vadd.f32 %v2277_v24, %v4733_v7 }
 0x48e   : > { %v2279_v8 = vpop.permute.xlu1 %2278 }
 0x48f   : > { %2583 = vst.msk [vmem:[%s3712_s5 + $0x58] sm:$0xff] %vm831_vm5, %v2551_v47  ;;  %2580 = vst.msk [vmem:[%s3712_s5 + $0x40] sm:$0xff] %vm831_vm5, %v2548_v22  ;;  %v2549_v33 = vadd.f32 %v3123_v11, %v2517_v50  ;;  %v2357_v57 = vadd.f32 %v2279_v8, %v4739_v32  ;;  %v3129_v32 = vld [vmem:[%s3712_s5 + $0x98] sm:$0xff] }
 0x490   : > { %v2403_v31 = vpop.permute.xlu0 %2402 }
 0x491   : > { %2581 = vst.msk [vmem:[%s3712_s5 + $0x48] sm:$0xff] %vm831_vm5, %v2549_v33  ;;  %v3130_v33 = vld [vmem:[%s3712_s5 + $0x80] sm:$0xff] }
 0x492   : > { %v2405_v51 = vpop.permute.xlu1 %2404 }
 0x494   : > { %v2273_v18 = vpop.permute.xlu0 %2272 }
 0x495   : > { %v2354_v56 = vadd.f32 %v4705_v12, %v2273_v18  ;;  %v3124_v12 = vld [vmem:[%s3712_s5 + $0x70] sm:$0xff] }
 0x496   : > { %v2275_v38 = vpop.permute.xlu1 %2274 }
 0x497   : > { %v2484_v52 = vadd.f32 %v2403_v31, %v2354_v56  ;;  %v2355_v3 = vadd.f32 %v4711_v28, %v2275_v38  ;;  %v3131_v56 = vld [vmem:[%s3712_s5 + $0x88] sm:$0xff] }
 0x498   : > { %v2399_v5 = vpop.permute.xlu0 %2398 }
 0x499   : > { %v2522_v14 = vadd.f32 %v4837_v13, %v2484_v52  ;;  %v2485_v40 = vadd.f32 %v2405_v51, %v2355_v3  ;;  %v2482_v0 = vadd.f32 %v2399_v5, %v2352_v44 }
 0x49a   : > { %v2401_v2 = vpop.permute.xlu1 %2400 }
 0x49b   : > { %v2554_v37 = vadd.f32 %v3124_v12, %v2522_v14  ;;  %v2523_v1 = vadd.f32 %v4837_v13, %v2485_v40  ;;  %v2520_v29 = vadd.f32 %v4837_v13, %v2482_v0  ;;  %v2483_v28 = vadd.f32 %v2401_v2, %v2353_v54 }
 0x49c   : > { %v2285_v39 = vpop.permute.xlu0 %2284 }
 0x49d   : > { %2586 = vst.msk [vmem:[%s3712_s5 + $0x70] sm:$0xff] %vm831_vm5, %v2554_v37  ;;  %v2555_v43 = vadd.f32 %v3125_v48, %v2523_v1  ;;  %v2552_v9 = vadd.f32 %v3126_v21, %v2520_v29  ;;  %v2521_v49 = vadd.f32 %v4837_v13, %v2483_v28  ;;  %v2360_v14 = vadd.f32 %v2285_v39, %v4757_v35 }
 0x49e   : > { %v2287_v17 = vpop.permute.xlu1 %2286 }
 0x49f   : > { %2587 = vst.msk [vmem:[%s3712_s5 + $0x78] sm:$0xff] %vm831_vm5, %v2555_v43  ;;  %2584 = vst.msk [vmem:[%s3712_s5 + $0x60] sm:$0xff] %vm831_vm5, %v2552_v9  ;;  %v2553_v46 = vadd.f32 %v3127_v62, %v2521_v49  ;;  %v2361_v12 = vadd.f32 %v2287_v17, %v4763_v59  ;;  %v3133_v59 = vld [vmem:[%s3712_s5 + $0xb8] sm:$0xff]  ;;  %v3134_v9 = vld [vmem:[%s3712_s5 + $0xa0] sm:$0xff] }
 0x4a0   : > { %v2411_v60 = vpop.permute.xlu0 %2410 }
 0x4a1   : > { %2585 = vst.msk [vmem:[%s3712_s5 + $0x68] sm:$0xff] %vm831_vm5, %v2553_v46  ;;  %v3135_v46 = vld [vmem:[%s3712_s5 + $0xa8] sm:$0xff] }
 0x4a2   : > { %v2413_v23 = vpop.permute.xlu1 %2412 }
 0x4a4   : > { %v2281_v41 = vpop.permute.xlu0 %2280 }
 0x4a5   : > { %v2358_v20 = vadd.f32 %v4729_v53, %v2281_v41  ;;  %v3128_v53 = vld [vmem:[%s3712_s5 + $0x90] sm:$0xff] }
 0x4a6   : > { %v2283_v6 = vpop.permute.xlu1 %2282 }
 0x4a7   : > { %v2488_v58 = vadd.f32 %v2411_v60, %v2358_v20  ;;  %v2359_v34 = vadd.f32 %v4735_v26, %v2283_v6 }
 0x4a8   : > { %v2407_v42 = vpop.permute.xlu0 %2406 }
 0x4a9   : > { %v2526_v63 = vadd.f32 %v4837_v13, %v2488_v58  ;;  %v2489_v47 = vadd.f32 %v2413_v23, %v2359_v34  ;;  %v2486_v16 = vadd.f32 %v2407_v42, %v2356_v25 }
 0x4aa   : > { %v2409_v22 = vpop.permute.xlu1 %2408 }
 0x4ab   : > { %v2558_v50 = vadd.f32 %v3128_v53, %v2526_v63  ;;  %v2527_v7 = vadd.f32 %v4837_v13, %v2489_v47  ;;  %v2524_v24 = vadd.f32 %v4837_v13, %v2486_v16  ;;  %v2487_v26 = vadd.f32 %v2409_v22, %v2357_v57 }
 0x4ad   : > { %v2293_v11 = vpop.permute.xlu0 %2292  ;;  %2590 = vst.msk [vmem:[%s3712_s5 + $0x90] sm:$0xff] %vm831_vm5, %v2558_v50  ;;  %v2559_v8 = vadd.f32 %v3129_v32, %v2527_v7  ;;  %v2556_v31 = vadd.f32 %v3130_v33, %v2524_v24  ;;  %v2525_v51 = vadd.f32 %v4837_v13, %v2487_v26 }
 0x4ae   : > { %v2364_v58 = vadd.f32 %v2293_v11, %v4781_v61  ;;  %v3138_v11 = vld [vmem:[%s3712_s5 + $0xc0] sm:$0xff] }
 0x4af   : > { %v2295_v18 = vpop.permute.xlu1 %2294  ;;  %2591 = vst.msk [vmem:[%s3712_s5 + $0x98] sm:$0xff] %vm831_vm5, %v2559_v8  ;;  %2588 = vst.msk [vmem:[%s3712_s5 + $0x80] sm:$0xff] %vm831_vm5, %v2556_v31  ;;  %v2557_v38 = vadd.f32 %v3131_v56, %v2525_v51  ;;  %v3139_v51 = vld [vmem:[%s3712_s5 + $0xc8] sm:$0xff] }
 0x4b0   : > { %v2365_v63 = vadd.f32 %v2295_v18, %v4787_v10  ;;  %v3137_v10 = vld [vmem:[%s3712_s5 + $0xd8] sm:$0xff] }
 0x4b1   : > { %v2419_v44 = vpop.permute.xlu0 %2418  ;;  %2589 = vst.msk [vmem:[%s3712_s5 + $0x88] sm:$0xff] %vm831_vm5, %v2557_v38 }
 0x4b3   : > { %v2421_v52 = vpop.permute.xlu1 %2420 }
 0x4b5   : > { %v2289_v3 = vpop.permute.xlu0 %2288 }
 0x4b6   : > { %v2362_v5 = vadd.f32 %v4753_v27, %v2289_v3  ;;  %v3132_v27 = vld [vmem:[%s3712_s5 + $0xb0] sm:$0xff] }
 0x4b7   : > { %v2291_v54 = vpop.permute.xlu1 %2290 }
 0x4b8   : > { %v2492_v40 = vadd.f32 %v2419_v44, %v2362_v5  ;;  %v2363_v0 = vadd.f32 %v4759_v4, %v2291_v54 }
 0x4b9   : > { %v2415_v2 = vpop.permute.xlu0 %2414 }
 0x4ba   : > { %v2530_v37 = vadd.f32 %v4837_v13, %v2492_v40  ;;  %v2493_v1 = vadd.f32 %v2421_v52, %v2363_v0  ;;  %v2490_v29 = vadd.f32 %v2415_v2, %v2360_v14  ;;  %v3140_v40 = vld [vmem:[%s3712_s5 + $0xe0] sm:$0xff] }
 0x4bb   : > { %v2417_v28 = vpop.permute.xlu1 %2416 }
 0x4bc   : > { %v2562_v48 = vadd.f32 %v3132_v27, %v2530_v37  ;;  %v2531_v35 = vadd.f32 %v4837_v13, %v2493_v1  ;;  %v2528_v39 = vadd.f32 %v4837_v13, %v2490_v29  ;;  %v2491_v4 = vadd.f32 %v2417_v28, %v2361_v12 }
 0x4bd   : > { %v2301_v43 = vpop.permute.xlu0 %2300 }
 0x4be   : > { %2594 = vst.msk [vmem:[%s3712_s5 + $0xb0] sm:$0xff] %vm831_vm5, %v2562_v48  ;;  %v2563_v21 = vadd.f32 %v3133_v59, %v2531_v35  ;;  %v2560_v49 = vadd.f32 %v3134_v9, %v2528_v39  ;;  %v2529_v17 = vadd.f32 %v4837_v13, %v2491_v4  ;;  %v2368_v31 = vadd.f32 %v2301_v43, %v4797_v36  ;;  %v3143_v48 = vld [vmem:[%s3712_s5 + $0xf8] sm:$0xff] }
 0x4bf   : > { %v2303_v62 = vpop.permute.xlu1 %2302 }
 0x4c0   : > { %2595 = vst.msk [vmem:[%s3712_s5 + $0xb8] sm:$0xff] %vm831_vm5, %v2563_v21  ;;  %2592 = vst.msk [vmem:[%s3712_s5 + $0xa0] sm:$0xff] %vm831_vm5, %v2560_v49  ;;  %v2561_v60 = vadd.f32 %v3135_v46, %v2529_v17  ;;  %v2369_v38 = vadd.f32 %v2303_v62, %v4803_v19 }
 0x4c1   : > { %v2427_v23 = vpop.permute.xlu0 %2426 }
 0x4c2   : > { %2593 = vst.msk [vmem:[%s3712_s5 + $0xa8] sm:$0xff] %vm831_vm5, %v2561_v60 }
 0x4c3   : > { %v2429_v41 = vpop.permute.xlu1 %2428 }
 0x4c5   : > { %v2297_v20 = vpop.permute.xlu0 %2296 }
 0x4c6   : > { %v2366_v6 = vadd.f32 %v4777_v30, %v2297_v20  ;;  %v3136_v30 = vld [vmem:[%s3712_s5 + $0xd0] sm:$0xff] }
 0x4c7   : > { %v2299_v25 = vpop.permute.xlu1 %2298 }
 0x4c8   : > { %v2496_v34 = vadd.f32 %v2427_v23, %v2366_v6  ;;  %v2367_v42 = vadd.f32 %v4783_v45, %v2299_v25 }
 0x4c9   : > { %v2423_v57 = vpop.permute.xlu0 %2422 }
 0x4ca   : > { %v2534_v47 = vadd.f32 %v4837_v13, %v2496_v34  ;;  %v2497_v16 = vadd.f32 %v2429_v41, %v2367_v42  ;;  %v2494_v22 = vadd.f32 %v2423_v57, %v2364_v58 }
 0x4cb   : > { %v2425_v53 = vpop.permute.xlu1 %2424 }
 0x4cc   : > { %v2566_v50 = vadd.f32 %v3136_v30, %v2534_v47  ;;  %v2535_v61 = vadd.f32 %v4837_v13, %v2497_v16  ;;  %v2532_v7 = vadd.f32 %v4837_v13, %v2494_v22  ;;  %v2495_v24 = vadd.f32 %v2425_v53, %v2365_v63 }
 0x4cd   : > { %v2305_v45 = vpop.permute.xlu0 %2304 }
 0x4ce   : > { %2598 = vst.msk [vmem:[%s3712_s5 + $0xd0] sm:$0xff] %vm831_vm5, %v2566_v50  ;;  %v2567_v26 = vadd.f32 %v3137_v10, %v2535_v61  ;;  %v2564_v32 = vadd.f32 %v3138_v11, %v2532_v7  ;;  %v2533_v8 = vadd.f32 %v4837_v13, %v2495_v24  ;;  %v2370_v3 = vadd.f32 %v4793_v55, %v2305_v45  ;;  %v3141_v55 = vld [vmem:[%s3712_s5 + $0xe8] sm:$0xff] }
 0x4cf   : > { %v2307_v33 = vpop.permute.xlu1 %2306 }
 0x4d0   : > { %2599 = vst.msk [vmem:[%s3712_s5 + $0xd8] sm:$0xff] %vm831_vm5, %v2567_v26  ;;  %2596 = vst.msk [vmem:[%s3712_s5 + $0xc0] sm:$0xff] %vm831_vm5, %v2564_v32  ;;  %v2565_v18 = vadd.f32 %v3139_v51, %v2533_v8  ;;  %v2371_v14 = vadd.f32 %v4799_v15, %v2307_v33  ;;  %v3142_v15 = vld [vmem:[%s3712_s5 + $0xf0] sm:$0xff] }
 0x4d1   : > { %v2431_v56 = vpop.permute.xlu0 %2430 }
 0x4d2   : > { %2597 = vst.msk [vmem:[%s3712_s5 + $0xc8] sm:$0xff] %vm831_vm5, %v2565_v18  ;;  %v2498_v44 = vadd.f32 %v2431_v56, %v2368_v31 }
 0x4d3   : > { %v2433_v52 = vpop.permute.xlu1 %2432 }
 0x4d4   : > { %v2536_v36 = vadd.f32 %v4837_v13, %v2498_v44  ;;  %v2499_v5 = vadd.f32 %v2433_v52, %v2369_v38 }
 0x4d5   : > { %v2435_v54 = vpop.permute.xlu0 %2434 }
 0x4d6   : > { %v2568_v0 = vadd.f32 %v3140_v40, %v2536_v36  ;;  %v2537_v19 = vadd.f32 %v4837_v13, %v2499_v5  ;;  %v2500_v2 = vadd.f32 %v2435_v54, %v2370_v3 }
 0x4d7   : > { %v2437_v12 = vpop.permute.xlu1 %2436 }
 0x4d8   : > { %2600 = vst.msk [vmem:[%s3712_s5 + $0xe0] sm:$0xff] %vm831_vm5, %v2568_v0  ;;  %v2569_v37 = vadd.f32 %v3141_v55, %v2537_v19  ;;  %v2538_v1 = vadd.f32 %v4837_v13, %v2500_v2  ;;  %v2501_v29 = vadd.f32 %v2437_v12, %v2371_v14 }
 0x4da   : > { %2601 = vst.msk [vmem:[%s3712_s5 + $0xe8] sm:$0xff] %vm831_vm5, %v2569_v37  ;;  %v2570_v28 = vadd.f32 %v3142_v15, %v2538_v1  ;;  %v2539_v27 = vadd.f32 %v4837_v13, %v2501_v29 }
 0x4dc   : > { %2602 = vst.msk [vmem:[%s3712_s5 + $0xf0] sm:$0xff] %vm831_vm5, %v2570_v28  ;;  %v2571_v35 = vadd.f32 %v3143_v48, %v2539_v27 }
 0x4de   : > { %2603 = vst.msk [vmem:[%s3712_s5 + $0xf8] sm:$0xff] %vm831_vm5, %v2571_v35 }
 0x4df   : > { %3247 = shalt.err (!%p3244_p12)
}
 0x4e0   : > { %s3248_s5 = scalar_lea.hbm %s4998_s11, 4096  ;;  %s3252_s17 = scalar_lea.hbm %s5126_s15, 8192 }
 0x4e1   : > { %p3249_p13 = scmp.ne.s32.totalorder %s4998_s11, %s3248_s5  ;;  %p3253_p7 = scmp.lt.u32.totalorder %s4998_s11, %s5126_s15 }
 0x4e2   : > { %p3254_p11 = scmp.lt.u32.totalorder %s3252_s17, %s3248_s5  ;;  %p3256_p0 = scmp.lt.u32.totalorder %s3248_s5, %s4998_s11 }
 0x4e3   : > { %p3250_p2 = pnand %p3249_p13, %p5127_p10 }
 0x4e4   : > { %p3255_p6 = por %p3254_p11, %p3253_p7 }
 0x4e5   : > { %p3251_p3 = pneg %p3250_p2 }
 0x4e6   : > { %p3257_p8 = por %p3256_p0, %p3255_p6 }
 0x4e8   : > { %p3258_p4 = pnand %p3257_p8, %p3251_p3 }
 0x4ea   : > { %3261 = shalt.err (!%p3258_p4)
}
 0x4eb   : > { %s3374_s7 = smov 128   ;;  %s3375_s9 = smov 8  }
 0x4ec   : > { %2984 = dma.vmem_to_hbm [thread:$0]  (%p5127_p10), %s5000_s29, 4096, %s4998_s11, %s2605_s4, %s3374_s7, %s3374_s7, %s3375_s9  }
 0x4ed PF: > { %p3001_p9 = scmp.ge.s32.totalorder %s3360_s28, 2  ;;  %s2633_s25 = sand.u32 1, %s3332_s21  }
 0x4ee   : > { %p5128_p5 = scmp.ne.s32.totalorder %s5109_s20, 0  ;;  %s2634_s18 = scalar_lea.sflag [#allocation4], %s2633_s25 }
 0x4f0   : > { %p2997_p1 = pnand %p3001_p9, %p5128_p5 }
 0x4f2   : > { %3315 = dma.done.wait (!%p2997_p1), %s2634_s18, 4096  }
 0x4f3   : > { %3317 = vsyncadd (!%p2997_p1), %s2634_s18, 4294963200  ;;  %s24_s28 = sadd.s32 1, %s3360_s28   ;;  %s5129_s30 = sld [smem:[#allocation12_spill]] }
 0x4f4   : > { %p21_p12 = scmp.ge.s32.totalorder %s24_s28, 8   ;;  %s5130_s20 = sld [smem:[#allocation16_spill]] }
 0x4f5   : > { %s5131_s10 = sld [smem:[#allocation18_spill]]  ;;  %s5132_s25 = sld [smem:[#allocation14_spill]] }
 0x4f6   : > { %s5133_s13 = sld [smem:[#allocation15_spill]]  ;;  %s5134_s27 = sld [smem:[#allocation17_spill]] }
 0x4f7   : > { %s5135_s18 = smov %s3324_s19  ;;  %s5137_s21 = smov %s3336_s22 }
 0x4f8   : > { %s5138_s22 = smov %s3340_s23  ;;  %s5140_s24 = smov %s3352_s26 }
 0x4f9   : > { %s5136_s19 = smov %s5129_s30  ;;  %23 = sbr.rel (!%p21_p12) target bundleno = 16 (0x10), region = 119 }
 0x4fb   : > { %s5139_s23 = smov %s5131_s10 }
 0x4fc   : > { %s5141_s26 = smov %s5133_s13 }
 0x500   :  { %2639 = vsyncpa [#allocation3], 1 }
 0x501   :  { %2641 = vsyncpa [#allocation3 + $0x1], 1 }
 0x502   :  { %2642 = vsyncpa [#allocation6], 1 }
 0x503   :  { %2644 = vsyncpa [#allocation6 + $0x1], 1 }
 0x504   :  { %2645 = vsyncpa [#allocation4], 1 }
 0x505   :  { %2647 = vsyncpa [#allocation4 + $0x1], 1 }

</bundles_post_ra>
